<compile_context>
chip_gen: v5e
topology: v5e:2x2
jax: 0.10.0
libtpu: 0.0.40
codegen_flags: <defaults>
</compile_context>

<pallas_src>
import functools
import math

import jax
import jax.numpy as jnp
from jax.experimental import pallas as pl
from jax.experimental.pallas import tpu as pltpu


def _layer_norm(x, gamma, beta, eps=1e-5):
    mean = jnp.mean(x, axis=-1, keepdims=True)
    centered = x - mean
    var = jnp.mean(centered * centered, axis=-1, keepdims=True)
    return centered * jax.lax.rsqrt(var + eps) * gamma + beta


def _transformer_block_kernel(
    x_ref,
    wqkv_ref, bqkv_ref, wo_ref, bo_ref,
    ln1_g_ref, ln1_b_ref,
    w1_ref, b1_ref, w2_ref, b2_ref,
    ln2_g_ref, ln2_b_ref,
    out_ref, attn_ref,
    *, n_heads: int,
):
    f32 = jnp.float32
    x = x_ref[0].astype(f32)                                   # (S, D)
    S, D = x.shape
    hd = D // n_heads
    scale = 1.0 / math.sqrt(hd)

    # Fused Q/K/V projection: one (S, D) @ (D, 3D) MXU matmul.
    qkv = jnp.dot(x, wqkv_ref[...], preferred_element_type=f32) + bqkv_ref[...]
    q = qkv[:, 0 * D:1 * D] * scale                            # fold 1/sqrt(hd) into q
    k = qkv[:, 1 * D:2 * D]
    v = qkv[:, 2 * D:3 * D]

    # Per-head attention. n_heads is small & static -> statically unrolled.
    # TODO(synk): optional attention mask (masked_fill) not wired in; the reference
    # forward here is exercised with mask=None.
    head_outs = []
    for h in range(n_heads):
        sl = slice(h * hd, (h + 1) * hd)
        qh, kh, vh = q[:, sl], k[:, sl], v[:, sl]
        scores = jnp.dot(qh, kh.T, preferred_element_type=f32)          # (S, S)
        scores = scores - jnp.max(scores, axis=-1, keepdims=True)
        p = jnp.exp(scores)
        p = p * pl.reciprocal(jnp.sum(p, axis=-1, keepdims=True), approx=False)
        attn_ref[0, h] = p.astype(attn_ref.dtype)
        head_outs.append(jnp.dot(p, vh, preferred_element_type=f32))    # (S, hd)

    attn_out = jnp.concatenate(head_outs, axis=-1)                      # (S, D)
    attn_out = jnp.dot(attn_out, wo_ref[...], preferred_element_type=f32) + bo_ref[...]

    # Residual + LayerNorm 1
    y = _layer_norm(x + attn_out, ln1_g_ref[...], ln1_b_ref[...])

    # Position-wise FFN: ReLU(y @ W1 + b1) @ W2 + b2
    h1 = jnp.dot(y, w1_ref[...], preferred_element_type=f32) + b1_ref[...]
    h1 = jnp.maximum(h1, 0.0)
    ffn = jnp.dot(h1, w2_ref[...], preferred_element_type=f32) + b2_ref[...]

    # Residual + LayerNorm 2
    z = _layer_norm(y + ffn, ln2_g_ref[...], ln2_b_ref[...])
    out_ref[0] = z.astype(out_ref.dtype)


def _rep_spec(shape):
    """BlockSpec for a weight that is identical (fully resident) at every grid step."""
    zeros = (0,) * len(shape)
    return pl.BlockSpec(shape, lambda b, _z=zeros: _z)


def transformer_block(x, params, n_heads):
    """Pallas equivalent of TransformerBlock.forward(x, mask=None).

    Returns (output, attn_weights) like the PyTorch module.
    Weights are stored as (in_features, out_features); biases / LayerNorm params
    as (1, dim).
    """
    B, S, D = x.shape
    d_ff = params["w1"].shape[1]
    H = n_heads

    # Fuse the three QKV projection weights into one (D, 3D) matmul operand.
    wqkv = jnp.concatenate([params["wq"], params["wk"], params["wv"]], axis=1)
    bqkv = jnp.concatenate([params["bq"], params["bk"], params["bv"]], axis=1)

    kernel = functools.partial(_transformer_block_kernel, n_heads=n_heads)

    grid_spec = pltpu.PrefetchScalarGridSpec(
        num_scalar_prefetch=0,
        grid=(B,),
        in_specs=[
            pl.BlockSpec((1, S, D), lambda b: (b, 0, 0)),      # x
            _rep_spec((D, 3 * D)), _rep_spec((1, 3 * D)),      # fused Wqkv, bqkv
            _rep_spec((D, D)), _rep_spec((1, D)),              # Wo, bo
            _rep_spec((1, D)), _rep_spec((1, D)),              # LN1 gamma, beta
            _rep_spec((D, d_ff)), _rep_spec((1, d_ff)),        # W1, b1
            _rep_spec((d_ff, D)), _rep_spec((1, D)),           # W2, b2
            _rep_spec((1, D)), _rep_spec((1, D)),              # LN2 gamma, beta
        ],
        out_specs=[
            pl.BlockSpec((1, S, D), lambda b: (b, 0, 0)),        # block output
            pl.BlockSpec((1, H, S, S), lambda b: (b, 0, 0, 0)),  # attn weights
        ],
    )

    flops = int(B * (8 * S * D * D + 4 * S * S * D + 4 * S * D * d_ff))
    transcendentals = int(B * (H * S * S + 2 * S))
    bytes_accessed = int(4 * (2 * B * S * D + B * H * S * S
                              + 4 * D * D + 2 * D * d_ff + 7 * D + d_ff))

    out, attn = pl.pallas_call(
        kernel,
        grid_spec=grid_spec,
        out_shape=(
            jax.ShapeDtypeStruct((B, S, D), x.dtype),
            jax.ShapeDtypeStruct((B, H, S, S), jnp.float32),
        ),
        compiler_params=pltpu.CompilerParams(
            dimension_semantics=("parallel",)),
        cost_estimate=pl.CostEstimate(
            flops=flops, transcendentals=transcendentals,
            bytes_accessed=bytes_accessed),
    )(
        x,
        wqkv, bqkv, params["wo"], params["bo"],
        params["ln1_g"], params["ln1_b"],
        params["w1"], params["b1"], params["w2"], params["b2"],
        params["ln2_g"], params["ln2_b"],
    )
    return out, attn


def _reference(x, params, n_heads, eps=1e-5):
    """Pure-JAX mirror of the PyTorch TransformerBlock forward (mask=None)."""
    B, S, D = x.shape
    hd = D // n_heads

    def lin(t, w, b):
        return jnp.einsum("bsd,de->bse", t, w) + b

    def ln(t, g, b):
        m = t.mean(-1, keepdims=True)
        var = ((t - m) ** 2).mean(-1, keepdims=True)
        return (t - m) / jnp.sqrt(var + eps) * g + b

    q = lin(x, params["wq"], params["bq"]).reshape(B, S, n_heads, hd).transpose(0, 2, 1, 3)
    k = lin(x, params["wk"], params["bk"]).reshape(B, S, n_heads, hd).transpose(0, 2, 1, 3)
    v = lin(x, params["wv"], params["bv"]).reshape(B, S, n_heads, hd).transpose(0, 2, 1, 3)

    scores = jnp.einsum("bhqd,bhkd->bhqk", q, k) / math.sqrt(hd)
    attn = jax.nn.softmax(scores, axis=-1)
    ao = jnp.einsum("bhqk,bhkd->bhqd", attn, v).transpose(0, 2, 1, 3).reshape(B, S, D)
    ao = lin(ao, params["wo"], params["bo"])

    y = ln(x + ao, params["ln1_g"], params["ln1_b"])
    ffn = lin(jax.nn.relu(lin(y, params["w1"], params["b1"])), params["w2"], params["b2"])
    z = ln(y + ffn, params["ln2_g"], params["ln2_b"])
    return z, attn


if __name__ == "__main__":
    # Small deterministic shapes consistent with the module. d_model is a multiple
    # of 128 (lane-dense output), seq a multiple of 8 (sublane aligned).
    d_model, n_heads, d_ff = 128, 4, 256
    batch, seq = 2, 8

    key = jax.random.PRNGKey(0)
    ks = jax.random.split(key, 16)

    def w(k, shape, scale=0.05):
        return (scale * jax.random.normal(k, shape)).astype(jnp.float32)

    params = {
        "wq": w(ks[0], (d_model, d_model)), "bq": w(ks[1], (1, d_model)),
        "wk": w(ks[2], (d_model, d_model)), "bk": w(ks[3], (1, d_model)),
        "wv": w(ks[4], (d_model, d_model)), "bv": w(ks[5], (1, d_model)),
        "wo": w(ks[6], (d_model, d_model)), "bo": w(ks[7], (1, d_model)),
        "ln1_g": 1.0 + w(ks[8], (1, d_model)), "ln1_b": w(ks[9], (1, d_model)),
        "w1": w(ks[10], (d_model, d_ff)), "b1": w(ks[11], (1, d_ff)),
        "w2": w(ks[12], (d_ff, d_model)), "b2": w(ks[13], (1, d_model)),
        "ln2_g": 1.0 + w(ks[14], (1, d_model)), "ln2_b": w(ks[15], (1, d_model)),
    }
    x = jax.random.normal(jax.random.PRNGKey(1), (batch, seq, d_model), dtype=jnp.float32)

    out, attn = transformer_block(x, params, n_heads)
    out = jax.block_until_ready(out)
    attn = jax.block_until_ready(attn)

    ref_out, ref_attn = _reference(x, params, n_heads)

    assert out.shape == (batch, seq, d_model)
    assert attn.shape == (batch, n_heads, seq, seq)
    assert jnp.allclose(attn, ref_attn, atol=1e-5, rtol=1e-5), "attn weights mismatch"
    assert jnp.allclose(out, ref_out, atol=2e-4, rtol=2e-4), "block output mismatch"

    print("KERNEL_OK")
</pallas_src>

<mosaic_0001>
module attributes {stable_mosaic.version = 11 : i64} {
  func.func @_transformer_block_kernel(%arg0: i32, %arg1: memref<1x8x128xf32, #tpu.memory_space<vmem>>, %arg2: memref<128x384xf32, #tpu.memory_space<vmem>>, %arg3: memref<1x384xf32, #tpu.memory_space<vmem>>, %arg4: memref<128x128xf32, #tpu.memory_space<vmem>>, %arg5: memref<1x128xf32, #tpu.memory_space<vmem>>, %arg6: memref<1x128xf32, #tpu.memory_space<vmem>>, %arg7: memref<1x128xf32, #tpu.memory_space<vmem>>, %arg8: memref<128x256xf32, #tpu.memory_space<vmem>>, %arg9: memref<1x256xf32, #tpu.memory_space<vmem>>, %arg10: memref<256x128xf32, #tpu.memory_space<vmem>>, %arg11: memref<1x128xf32, #tpu.memory_space<vmem>>, %arg12: memref<1x128xf32, #tpu.memory_space<vmem>>, %arg13: memref<1x128xf32, #tpu.memory_space<vmem>>, %arg14: memref<1x8x128xf32, #tpu.memory_space<vmem>>, %arg15: memref<1x4x8x8xf32, #tpu.memory_space<vmem>>) attributes {dimension_semantics = [#tpu.dimension_semantics<parallel>], iteration_bounds = array<i64: 2>, scalar_prefetch = 0 : i64, scratch_operands = 0 : i64, tpu.core_type = #tpu.core_type<tc>, window_params = [{transform_indices = @transform_0, window_bounds = array<i64: 1, 8, 128>}, {pipeline_mode = #tpu.pipeline_mode<synchronous>, transform_indices = @transform_1, window_bounds = array<i64: 128, 384>}, {pipeline_mode = #tpu.pipeline_mode<synchronous>, transform_indices = @transform_2, window_bounds = array<i64: 1, 384>}, {pipeline_mode = #tpu.pipeline_mode<synchronous>, transform_indices = @transform_3, window_bounds = array<i64: 128, 128>}, {pipeline_mode = #tpu.pipeline_mode<synchronous>, transform_indices = @transform_4, window_bounds = array<i64: 1, 128>}, {pipeline_mode = #tpu.pipeline_mode<synchronous>, transform_indices = @transform_5, window_bounds = array<i64: 1, 128>}, {pipeline_mode = #tpu.pipeline_mode<synchronous>, transform_indices = @transform_6, window_bounds = array<i64: 1, 128>}, {pipeline_mode = #tpu.pipeline_mode<synchronous>, transform_indices = @transform_7, window_bounds = array<i64: 128, 256>}, {pipeline_mode = #tpu.pipeline_mode<synchronous>, transform_indices = @transform_8, window_bounds = array<i64: 1, 256>}, {pipeline_mode = #tpu.pipeline_mode<synchronous>, transform_indices = @transform_9, window_bounds = array<i64: 256, 128>}, {pipeline_mode = #tpu.pipeline_mode<synchronous>, transform_indices = @transform_10, window_bounds = array<i64: 1, 128>}, {pipeline_mode = #tpu.pipeline_mode<synchronous>, transform_indices = @transform_11, window_bounds = array<i64: 1, 128>}, {pipeline_mode = #tpu.pipeline_mode<synchronous>, transform_indices = @transform_12, window_bounds = array<i64: 1, 128>}, {transform_indices = @transform_13, window_bounds = array<i64: 1, 8, 128>}, {transform_indices = @transform_14, window_bounds = array<i64: 1, 4, 8, 8>}]} {
    %c0 = arith.constant 0 : index
    %c0_0 = arith.constant 0 : index
    %c0_1 = arith.constant 0 : index
    %0 = vector.load %arg1[%c0, %c0_0, %c0_1] : memref<1x8x128xf32, #tpu.memory_space<vmem>>, vector<1x8x128xf32>
    %1 = vector.shape_cast %0 : vector<1x8x128xf32> to vector<8x128xf32>
    %c0_2 = arith.constant 0 : index
    %c0_3 = arith.constant 0 : index
    %2 = vector.load %arg2[%c0_2, %c0_3] : memref<128x384xf32, #tpu.memory_space<vmem>>, vector<128x384xf32>
    %cst = arith.constant dense<0.000000e+00> : vector<8x384xf32>
    %3 = tpu.matmul %1, %2, %cst {dimension_numbers = #tpu.dot_dimension_numbers<[1], [0], [0], [1], [0, 0, 1, 1], [], []>} : vector<8x128xf32>, vector<128x384xf32>, vector<8x384xf32> -> vector<8x384xf32>
    %c0_4 = arith.constant 0 : index
    %c0_5 = arith.constant 0 : index
    %4 = vector.load %arg3[%c0_4, %c0_5] : memref<1x384xf32, #tpu.memory_space<vmem>>, vector<1x384xf32>
    %5 = vector.broadcast %4 : vector<1x384xf32> to vector<8x384xf32>
    %6 = arith.addf %3, %5 : vector<8x384xf32>
    %7 = vector.extract_strided_slice %6 {offsets = [0, 0], sizes = [8, 128], strides = [1, 1]} : vector<8x384xf32> to vector<8x128xf32>
    %cst_6 = arith.constant 0.176776692 : f32
    %8 = vector.broadcast %cst_6 : f32 to vector<8x128xf32>
    %9 = arith.mulf %7, %8 : vector<8x128xf32>
    %10 = vector.extract_strided_slice %6 {offsets = [0, 128], sizes = [8, 128], strides = [1, 1]} : vector<8x384xf32> to vector<8x128xf32>
    %11 = vector.extract_strided_slice %6 {offsets = [0, 256], sizes = [8, 128], strides = [1, 1]} : vector<8x384xf32> to vector<8x128xf32>
    %12 = vector.extract_strided_slice %9 {offsets = [0, 0], sizes = [8, 32], strides = [1, 1]} : vector<8x128xf32> to vector<8x32xf32>
    %13 = vector.extract_strided_slice %10 {offsets = [0, 0], sizes = [8, 32], strides = [1, 1]} : vector<8x128xf32> to vector<8x32xf32>
    %14 = vector.extract_strided_slice %11 {offsets = [0, 0], sizes = [8, 32], strides = [1, 1]} : vector<8x128xf32> to vector<8x32xf32>
    %15 = tpu.transpose %13, [1, 0] : vector<8x32xf32> -> vector<32x8xf32>
    %cst_7 = arith.constant dense<0.000000e+00> : vector<8x8xf32>
    %16 = tpu.matmul %12, %15, %cst_7 {dimension_numbers = #tpu.dot_dimension_numbers<[1], [0], [0], [1], [0, 0, 1, 1], [], []>} : vector<8x32xf32>, vector<32x8xf32>, vector<8x8xf32> -> vector<8x8xf32>
    %cst_8 = arith.constant dense<0xFF800000> : vector<8xf32>
    %17 = vector.multi_reduction <maximumf>, %16, %cst_8 [1] : vector<8x8xf32> to vector<8xf32>
    %18 = vector.shape_cast %17 : vector<8xf32> to vector<8x1xf32>
    %19 = vector.broadcast %18 : vector<8x1xf32> to vector<8x8xf32>
    %20 = arith.subf %16, %19 : vector<8x8xf32>
    %21 = math.exp %20 : vector<8x8xf32>
    %cst_9 = arith.constant dense<0.000000e+00> : vector<8xf32>
    %22 = vector.multi_reduction <add>, %21, %cst_9 [1] : vector<8x8xf32> to vector<8xf32>
    %23 = vector.shape_cast %22 : vector<8xf32> to vector<8x1xf32>
    %24 = tpu.reciprocal %23 : vector<8x1xf32> -> vector<8x1xf32>
    %25 = vector.broadcast %24 : vector<8x1xf32> to vector<8x8xf32>
    %26 = arith.mulf %21, %25 : vector<8x8xf32>
    %c0_10 = arith.constant 0 : index
    %c0_11 = arith.constant 0 : index
    %c0_12 = arith.constant 0 : index
    %c0_13 = arith.constant 0 : index
    %27 = vector.load %arg15[%c0_10, %c0_11, %c0_12, %c0_13] : memref<1x4x8x8xf32, #tpu.memory_space<vmem>>, vector<1x1x8x8xf32>
    %28 = vector.shape_cast %27 : vector<1x1x8x8xf32> to vector<8x8xf32>
    %29 = vector.shape_cast %26 : vector<8x8xf32> to vector<1x1x8x8xf32>
    tpu.vector_store %arg15[%c0_10, %c0_11, %c0_12, %c0_13], %29 {strides = array<i32>} : memref<1x4x8x8xf32, #tpu.memory_space<vmem>>, vector<1x1x8x8xf32>,
    %cst_14 = arith.constant dense<0.000000e+00> : vector<8x32xf32>
    %30 = tpu.matmul %26, %14, %cst_14 {dimension_numbers = #tpu.dot_dimension_numbers<[1], [0], [0], [1], [0, 0, 1, 1], [], []>} : vector<8x8xf32>, vector<8x32xf32>, vector<8x32xf32> -> vector<8x32xf32>
    %31 = vector.extract_strided_slice %9 {offsets = [0, 32], sizes = [8, 32], strides = [1, 1]} : vector<8x128xf32> to vector<8x32xf32>
    %32 = vector.extract_strided_slice %10 {offsets = [0, 32], sizes = [8, 32], strides = [1, 1]} : vector<8x128xf32> to vector<8x32xf32>
    %33 = vector.extract_strided_slice %11 {offsets = [0, 32], sizes = [8, 32], strides = [1, 1]} : vector<8x128xf32> to vector<8x32xf32>
    %34 = tpu.transpose %32, [1, 0] : vector<8x32xf32> -> vector<32x8xf32>
    %cst_15 = arith.constant dense<0.000000e+00> : vector<8x8xf32>
    %35 = tpu.matmul %31, %34, %cst_15 {dimension_numbers = #tpu.dot_dimension_numbers<[1], [0], [0], [1], [0, 0, 1, 1], [], []>} : vector<8x32xf32>, vector<32x8xf32>, vector<8x8xf32> -> vector<8x8xf32>
    %cst_16 = arith.constant dense<0xFF800000> : vector<8xf32>
    %36 = vector.multi_reduction <maximumf>, %35, %cst_16 [1] : vector<8x8xf32> to vector<8xf32>
    %37 = vector.shape_cast %36 : vector<8xf32> to vector<8x1xf32>
    %38 = vector.broadcast %37 : vector<8x1xf32> to vector<8x8xf32>
    %39 = arith.subf %35, %38 : vector<8x8xf32>
    %40 = math.exp %39 : vector<8x8xf32>
    %cst_17 = arith.constant dense<0.000000e+00> : vector<8xf32>
    %41 = vector.multi_reduction <add>, %40, %cst_17 [1] : vector<8x8xf32> to vector<8xf32>
    %42 = vector.shape_cast %41 : vector<8xf32> to vector<8x1xf32>
    %43 = tpu.reciprocal %42 : vector<8x1xf32> -> vector<8x1xf32>
    %44 = vector.broadcast %43 : vector<8x1xf32> to vector<8x8xf32>
    %45 = arith.mulf %40, %44 : vector<8x8xf32>
    %c0_18 = arith.constant 0 : index
    %c1 = arith.constant 1 : index
    %c0_19 = arith.constant 0 : index
    %c0_20 = arith.constant 0 : index
    %46 = vector.load %arg15[%c0_18, %c1, %c0_19, %c0_20] : memref<1x4x8x8xf32, #tpu.memory_space<vmem>>, vector<1x1x8x8xf32>
    %47 = vector.shape_cast %46 : vector<1x1x8x8xf32> to vector<8x8xf32>
    %48 = vector.shape_cast %45 : vector<8x8xf32> to vector<1x1x8x8xf32>
    tpu.vector_store %arg15[%c0_18, %c1, %c0_19, %c0_20], %48 {strides = array<i32>} : memref<1x4x8x8xf32, #tpu.memory_space<vmem>>, vector<1x1x8x8xf32>,
    %cst_21 = arith.constant dense<0.000000e+00> : vector<8x32xf32>
    %49 = tpu.matmul %45, %33, %cst_21 {dimension_numbers = #tpu.dot_dimension_numbers<[1], [0], [0], [1], [0, 0, 1, 1], [], []>} : vector<8x8xf32>, vector<8x32xf32>, vector<8x32xf32> -> vector<8x32xf32>
    %50 = vector.extract_strided_slice %9 {offsets = [0, 64], sizes = [8, 32], strides = [1, 1]} : vector<8x128xf32> to vector<8x32xf32>
    %51 = vector.extract_strided_slice %10 {offsets = [0, 64], sizes = [8, 32], strides = [1, 1]} : vector<8x128xf32> to vector<8x32xf32>
    %52 = vector.extract_strided_slice %11 {offsets = [0, 64], sizes = [8, 32], strides = [1, 1]} : vector<8x128xf32> to vector<8x32xf32>
    %53 = tpu.transpose %51, [1, 0] : vector<8x32xf32> -> vector<32x8xf32>
    %cst_22 = arith.constant dense<0.000000e+00> : vector<8x8xf32>
    %54 = tpu.matmul %50, %53, %cst_22 {dimension_numbers = #tpu.dot_dimension_numbers<[1], [0], [0], [1], [0, 0, 1, 1], [], []>} : vector<8x32xf32>, vector<32x8xf32>, vector<8x8xf32> -> vector<8x8xf32>
    %cst_23 = arith.constant dense<0xFF800000> : vector<8xf32>
    %55 = vector.multi_reduction <maximumf>, %54, %cst_23 [1] : vector<8x8xf32> to vector<8xf32>
    %56 = vector.shape_cast %55 : vector<8xf32> to vector<8x1xf32>
    %57 = vector.broadcast %56 : vector<8x1xf32> to vector<8x8xf32>
    %58 = arith.subf %54, %57 : vector<8x8xf32>
    %59 = math.exp %58 : vector<8x8xf32>
    %cst_24 = arith.constant dense<0.000000e+00> : vector<8xf32>
    %60 = vector.multi_reduction <add>, %59, %cst_24 [1] : vector<8x8xf32> to vector<8xf32>
    %61 = vector.shape_cast %60 : vector<8xf32> to vector<8x1xf32>
    %62 = tpu.reciprocal %61 : vector<8x1xf32> -> vector<8x1xf32>
    %63 = vector.broadcast %62 : vector<8x1xf32> to vector<8x8xf32>
    %64 = arith.mulf %59, %63 : vector<8x8xf32>
    %c0_25 = arith.constant 0 : index
    %c2 = arith.constant 2 : index
    %c0_26 = arith.constant 0 : index
    %c0_27 = arith.constant 0 : index
    %65 = vector.load %arg15[%c0_25, %c2, %c0_26, %c0_27] : memref<1x4x8x8xf32, #tpu.memory_space<vmem>>, vector<1x1x8x8xf32>
    %66 = vector.shape_cast %65 : vector<1x1x8x8xf32> to vector<8x8xf32>
    %67 = vector.shape_cast %64 : vector<8x8xf32> to vector<1x1x8x8xf32>
    tpu.vector_store %arg15[%c0_25, %c2, %c0_26, %c0_27], %67 {strides = array<i32>} : memref<1x4x8x8xf32, #tpu.memory_space<vmem>>, vector<1x1x8x8xf32>,
    %cst_28 = arith.constant dense<0.000000e+00> : vector<8x32xf32>
    %68 = tpu.matmul %64, %52, %cst_28 {dimension_numbers = #tpu.dot_dimension_numbers<[1], [0], [0], [1], [0, 0, 1, 1], [], []>} : vector<8x8xf32>, vector<8x32xf32>, vector<8x32xf32> -> vector<8x32xf32>
    %69 = vector.extract_strided_slice %9 {offsets = [0, 96], sizes = [8, 32], strides = [1, 1]} : vector<8x128xf32> to vector<8x32xf32>
    %70 = vector.extract_strided_slice %10 {offsets = [0, 96], sizes = [8, 32], strides = [1, 1]} : vector<8x128xf32> to vector<8x32xf32>
    %71 = vector.extract_strided_slice %11 {offsets = [0, 96], sizes = [8, 32], strides = [1, 1]} : vector<8x128xf32> to vector<8x32xf32>
    %72 = tpu.transpose %70, [1, 0] : vector<8x32xf32> -> vector<32x8xf32>
    %cst_29 = arith.constant dense<0.000000e+00> : vector<8x8xf32>
    %73 = tpu.matmul %69, %72, %cst_29 {dimension_numbers = #tpu.dot_dimension_numbers<[1], [0], [0], [1], [0, 0, 1, 1], [], []>} : vector<8x32xf32>, vector<32x8xf32>, vector<8x8xf32> -> vector<8x8xf32>
    %cst_30 = arith.constant dense<0xFF800000> : vector<8xf32>
    %74 = vector.multi_reduction <maximumf>, %73, %cst_30 [1] : vector<8x8xf32> to vector<8xf32>
    %75 = vector.shape_cast %74 : vector<8xf32> to vector<8x1xf32>
    %76 = vector.broadcast %75 : vector<8x1xf32> to vector<8x8xf32>
    %77 = arith.subf %73, %76 : vector<8x8xf32>
    %78 = math.exp %77 : vector<8x8xf32>
    %cst_31 = arith.constant dense<0.000000e+00> : vector<8xf32>
    %79 = vector.multi_reduction <add>, %78, %cst_31 [1] : vector<8x8xf32> to vector<8xf32>
    %80 = vector.shape_cast %79 : vector<8xf32> to vector<8x1xf32>
    %81 = tpu.reciprocal %80 : vector<8x1xf32> -> vector<8x1xf32>
    %82 = vector.broadcast %81 : vector<8x1xf32> to vector<8x8xf32>
    %83 = arith.mulf %78, %82 : vector<8x8xf32>
    %c0_32 = arith.constant 0 : index
    %c3 = arith.constant 3 : index
    %c0_33 = arith.constant 0 : index
    %c0_34 = arith.constant 0 : index
    %84 = vector.load %arg15[%c0_32, %c3, %c0_33, %c0_34] : memref<1x4x8x8xf32, #tpu.memory_space<vmem>>, vector<1x1x8x8xf32>
    %85 = vector.shape_cast %84 : vector<1x1x8x8xf32> to vector<8x8xf32>
    %86 = vector.shape_cast %83 : vector<8x8xf32> to vector<1x1x8x8xf32>
    tpu.vector_store %arg15[%c0_32, %c3, %c0_33, %c0_34], %86 {strides = array<i32>} : memref<1x4x8x8xf32, #tpu.memory_space<vmem>>, vector<1x1x8x8xf32>,
    %cst_35 = arith.constant dense<0.000000e+00> : vector<8x32xf32>
    %87 = tpu.matmul %83, %71, %cst_35 {dimension_numbers = #tpu.dot_dimension_numbers<[1], [0], [0], [1], [0, 0, 1, 1], [], []>} : vector<8x8xf32>, vector<8x32xf32>, vector<8x32xf32> -> vector<8x32xf32>
    %88 = tpu.concatenate %30, %49, %68, %87 in 1 : vector<8x32xf32>, vector<8x32xf32>, vector<8x32xf32>, vector<8x32xf32> -> vector<8x128xf32>
    %c0_36 = arith.constant 0 : index
    %c0_37 = arith.constant 0 : index
    %89 = vector.load %arg4[%c0_36, %c0_37] : memref<128x128xf32, #tpu.memory_space<vmem>>, vector<128x128xf32>
    %cst_38 = arith.constant dense<0.000000e+00> : vector<8x128xf32>
    %90 = tpu.matmul %88, %89, %cst_38 {dimension_numbers = #tpu.dot_dimension_numbers<[1], [0], [0], [1], [0, 0, 1, 1], [], []>} : vector<8x128xf32>, vector<128x128xf32>, vector<8x128xf32> -> vector<8x128xf32>
    %c0_39 = arith.constant 0 : index
    %c0_40 = arith.constant 0 : index
    %91 = vector.load %arg5[%c0_39, %c0_40] : memref<1x128xf32, #tpu.memory_space<vmem>>, vector<1x128xf32>
    %92 = vector.broadcast %91 : vector<1x128xf32> to vector<8x128xf32>
    %93 = arith.addf %90, %92 : vector<8x128xf32>
    %94 = arith.addf %1, %93 : vector<8x128xf32>
    %c0_41 = arith.constant 0 : index
    %c0_42 = arith.constant 0 : index
    %95 = vector.load %arg6[%c0_41, %c0_42] : memref<1x128xf32, #tpu.memory_space<vmem>>, vector<1x128xf32>
    %c0_43 = arith.constant 0 : index
    %c0_44 = arith.constant 0 : index
    %96 = vector.load %arg7[%c0_43, %c0_44] : memref<1x128xf32, #tpu.memory_space<vmem>>, vector<1x128xf32>
    %cst_45 = arith.constant dense<0.000000e+00> : vector<8xf32>
    %97 = vector.multi_reduction <add>, %94, %cst_45 [1] : vector<8x128xf32> to vector<8xf32>
    %98 = vector.shape_cast %97 : vector<8xf32> to vector<8x1xf32>
    %cst_46 = arith.constant 1.280000e+02 : f32
    %99 = vector.broadcast %cst_46 : f32 to vector<8x1xf32>
    %100 = arith.divf %98, %99 : vector<8x1xf32>
    %101 = vector.broadcast %100 : vector<8x1xf32> to vector<8x128xf32>
    %102 = arith.subf %94, %101 : vector<8x128xf32>
    %103 = arith.mulf %102, %102 : vector<8x128xf32>
    %cst_47 = arith.constant dense<0.000000e+00> : vector<8xf32>
    %104 = vector.multi_reduction <add>, %103, %cst_47 [1] : vector<8x128xf32> to vector<8xf32>
    %105 = vector.shape_cast %104 : vector<8xf32> to vector<8x1xf32>
    %cst_48 = arith.constant 1.280000e+02 : f32
    %106 = vector.broadcast %cst_48 : f32 to vector<8x1xf32>
    %107 = arith.divf %105, %106 : vector<8x1xf32>
    %cst_49 = arith.constant 9.99999974E-6 : f32
    %108 = vector.broadcast %cst_49 : f32 to vector<8x1xf32>
    %109 = arith.addf %107, %108 : vector<8x1xf32>
    %110 = math.rsqrt %109 : vector<8x1xf32>
    %111 = vector.broadcast %110 : vector<8x1xf32> to vector<8x128xf32>
    %112 = arith.mulf %102, %111 : vector<8x128xf32>
    %113 = vector.broadcast %95 : vector<1x128xf32> to vector<8x128xf32>
    %114 = arith.mulf %112, %113 : vector<8x128xf32>
    %115 = vector.broadcast %96 : vector<1x128xf32> to vector<8x128xf32>
    %116 = arith.addf %114, %115 : vector<8x128xf32>
    %c0_50 = arith.constant 0 : index
    %c0_51 = arith.constant 0 : index
    %117 = vector.load %arg8[%c0_50, %c0_51] : memref<128x256xf32, #tpu.memory_space<vmem>>, vector<128x256xf32>
    %cst_52 = arith.constant dense<0.000000e+00> : vector<8x256xf32>
    %118 = tpu.matmul %116, %117, %cst_52 {dimension_numbers = #tpu.dot_dimension_numbers<[1], [0], [0], [1], [0, 0, 1, 1], [], []>} : vector<8x128xf32>, vector<128x256xf32>, vector<8x256xf32> -> vector<8x256xf32>
    %c0_53 = arith.constant 0 : index
    %c0_54 = arith.constant 0 : index
    %119 = vector.load %arg9[%c0_53, %c0_54] : memref<1x256xf32, #tpu.memory_space<vmem>>, vector<1x256xf32>
    %120 = vector.broadcast %119 : vector<1x256xf32> to vector<8x256xf32>
    %121 = arith.addf %118, %120 : vector<8x256xf32>
    %cst_55 = arith.constant 0.000000e+00 : f32
    %122 = vector.broadcast %cst_55 : f32 to vector<8x256xf32>
    %123 = arith.maximumf %121, %122 : vector<8x256xf32>
    %c0_56 = arith.constant 0 : index
    %c0_57 = arith.constant 0 : index
    %124 = vector.load %arg10[%c0_56, %c0_57] : memref<256x128xf32, #tpu.memory_space<vmem>>, vector<256x128xf32>
    %cst_58 = arith.constant dense<0.000000e+00> : vector<8x128xf32>
    %125 = tpu.matmul %123, %124, %cst_58 {dimension_numbers = #tpu.dot_dimension_numbers<[1], [0], [0], [1], [0, 0, 1, 1], [], []>} : vector<8x256xf32>, vector<256x128xf32>, vector<8x128xf32> -> vector<8x128xf32>
    %c0_59 = arith.constant 0 : index
    %c0_60 = arith.constant 0 : index
    %126 = vector.load %arg11[%c0_59, %c0_60] : memref<1x128xf32, #tpu.memory_space<vmem>>, vector<1x128xf32>
    %127 = vector.broadcast %126 : vector<1x128xf32> to vector<8x128xf32>
    %128 = arith.addf %125, %127 : vector<8x128xf32>
    %129 = arith.addf %116, %128 : vector<8x128xf32>
    %c0_61 = arith.constant 0 : index
    %c0_62 = arith.constant 0 : index
    %130 = vector.load %arg12[%c0_61, %c0_62] : memref<1x128xf32, #tpu.memory_space<vmem>>, vector<1x128xf32>
    %c0_63 = arith.constant 0 : index
    %c0_64 = arith.constant 0 : index
    %131 = vector.load %arg13[%c0_63, %c0_64] : memref<1x128xf32, #tpu.memory_space<vmem>>, vector<1x128xf32>
    %cst_65 = arith.constant dense<0.000000e+00> : vector<8xf32>
    %132 = vector.multi_reduction <add>, %129, %cst_65 [1] : vector<8x128xf32> to vector<8xf32>
    %133 = vector.shape_cast %132 : vector<8xf32> to vector<8x1xf32>
    %cst_66 = arith.constant 1.280000e+02 : f32
    %134 = vector.broadcast %cst_66 : f32 to vector<8x1xf32>
    %135 = arith.divf %133, %134 : vector<8x1xf32>
    %136 = vector.broadcast %135 : vector<8x1xf32> to vector<8x128xf32>
    %137 = arith.subf %129, %136 : vector<8x128xf32>
    %138 = arith.mulf %137, %137 : vector<8x128xf32>
    %cst_67 = arith.constant dense<0.000000e+00> : vector<8xf32>
    %139 = vector.multi_reduction <add>, %138, %cst_67 [1] : vector<8x128xf32> to vector<8xf32>
    %140 = vector.shape_cast %139 : vector<8xf32> to vector<8x1xf32>
    %cst_68 = arith.constant 1.280000e+02 : f32
    %141 = vector.broadcast %cst_68 : f32 to vector<8x1xf32>
    %142 = arith.divf %140, %141 : vector<8x1xf32>
    %cst_69 = arith.constant 9.99999974E-6 : f32
    %143 = vector.broadcast %cst_69 : f32 to vector<8x1xf32>
    %144 = arith.addf %142, %143 : vector<8x1xf32>
    %145 = math.rsqrt %144 : vector<8x1xf32>
    %146 = vector.broadcast %145 : vector<8x1xf32> to vector<8x128xf32>
    %147 = arith.mulf %137, %146 : vector<8x128xf32>
    %148 = vector.broadcast %130 : vector<1x128xf32> to vector<8x128xf32>
    %149 = arith.mulf %147, %148 : vector<8x128xf32>
    %150 = vector.broadcast %131 : vector<1x128xf32> to vector<8x128xf32>
    %151 = arith.addf %149, %150 : vector<8x128xf32>
    %c0_70 = arith.constant 0 : index
    %c0_71 = arith.constant 0 : index
    %c0_72 = arith.constant 0 : index
    %152 = vector.load %arg14[%c0_70, %c0_71, %c0_72] : memref<1x8x128xf32, #tpu.memory_space<vmem>>, vector<1x8x128xf32>
    %153 = vector.shape_cast %152 : vector<1x8x128xf32> to vector<8x128xf32>
    %154 = vector.shape_cast %151 : vector<8x128xf32> to vector<1x8x128xf32>
    tpu.vector_store %arg14[%c0_70, %c0_71, %c0_72], %154 {strides = array<i32>} : memref<1x8x128xf32, #tpu.memory_space<vmem>>, vector<1x8x128xf32>,
    return
  }
  func.func @transform_0(%arg0: i32) -> (i32, i32, i32) {
    %c0_i32 = arith.constant 0 : i32
    %c0_i32_0 = arith.constant 0 : i32
    %c0_i32_1 = arith.constant 0 : i32
    return %arg0, %c0_i32, %c0_i32_0 : i32, i32, i32
  }
  func.func @transform_1(%arg0: i32) -> (i32, i32) {
    %c0_i32 = arith.constant 0 : i32
    %c0_i32_0 = arith.constant 0 : i32
    %c0_i32_1 = arith.constant 0 : i32
    return %c0_i32, %c0_i32_0 : i32, i32
  }
  func.func @transform_2(%arg0: i32) -> (i32, i32) {
    %c0_i32 = arith.constant 0 : i32
    %c0_i32_0 = arith.constant 0 : i32
    %c0_i32_1 = arith.constant 0 : i32
    return %c0_i32, %c0_i32_0 : i32, i32
  }
  func.func @transform_3(%arg0: i32) -> (i32, i32) {
    %c0_i32 = arith.constant 0 : i32
    %c0_i32_0 = arith.constant 0 : i32
    %c0_i32_1 = arith.constant 0 : i32
    return %c0_i32, %c0_i32_0 : i32, i32
  }
  func.func @transform_4(%arg0: i32) -> (i32, i32) {
    %c0_i32 = arith.constant 0 : i32
    %c0_i32_0 = arith.constant 0 : i32
    %c0_i32_1 = arith.constant 0 : i32
    return %c0_i32, %c0_i32_0 : i32, i32
  }
  func.func @transform_5(%arg0: i32) -> (i32, i32) {
    %c0_i32 = arith.constant 0 : i32
    %c0_i32_0 = arith.constant 0 : i32
    %c0_i32_1 = arith.constant 0 : i32
    return %c0_i32, %c0_i32_0 : i32, i32
  }
  func.func @transform_6(%arg0: i32) -> (i32, i32) {
    %c0_i32 = arith.constant 0 : i32
    %c0_i32_0 = arith.constant 0 : i32
    %c0_i32_1 = arith.constant 0 : i32
    return %c0_i32, %c0_i32_0 : i32, i32
  }
  func.func @transform_7(%arg0: i32) -> (i32, i32) {
    %c0_i32 = arith.constant 0 : i32
    %c0_i32_0 = arith.constant 0 : i32
    %c0_i32_1 = arith.constant 0 : i32
    return %c0_i32, %c0_i32_0 : i32, i32
  }
  func.func @transform_8(%arg0: i32) -> (i32, i32) {
    %c0_i32 = arith.constant 0 : i32
    %c0_i32_0 = arith.constant 0 : i32
    %c0_i32_1 = arith.constant 0 : i32
    return %c0_i32, %c0_i32_0 : i32, i32
  }
  func.func @transform_9(%arg0: i32) -> (i32, i32) {
    %c0_i32 = arith.constant 0 : i32
    %c0_i32_0 = arith.constant 0 : i32
    %c0_i32_1 = arith.constant 0 : i32
    return %c0_i32, %c0_i32_0 : i32, i32
  }
  func.func @transform_10(%arg0: i32) -> (i32, i32) {
    %c0_i32 = arith.constant 0 : i32
    %c0_i32_0 = arith.constant 0 : i32
    %c0_i32_1 = arith.constant 0 : i32
    return %c0_i32, %c0_i32_0 : i32, i32
  }
  func.func @transform_11(%arg0: i32) -> (i32, i32) {
    %c0_i32 = arith.constant 0 : i32
    %c0_i32_0 = arith.constant 0 : i32
    %c0_i32_1 = arith.constant 0 : i32
    return %c0_i32, %c0_i32_0 : i32, i32
  }
  func.func @transform_12(%arg0: i32) -> (i32, i32) {
    %c0_i32 = arith.constant 0 : i32
    %c0_i32_0 = arith.constant 0 : i32
    %c0_i32_1 = arith.constant 0 : i32
    return %c0_i32, %c0_i32_0 : i32, i32
  }
  func.func @transform_13(%arg0: i32) -> (i32, i32, i32) {
    %c0_i32 = arith.constant 0 : i32
    %c0_i32_0 = arith.constant 0 : i32
    %c0_i32_1 = arith.constant 0 : i32
    return %arg0, %c0_i32, %c0_i32_0 : i32, i32, i32
  }
  func.func @transform_14(%arg0: i32) -> (i32, i32, i32, i32) {
    %c0_i32 = arith.constant 0 : i32
    %c0_i32_0 = arith.constant 0 : i32
    %c0_i32_1 = arith.constant 0 : i32
    %c0_i32_2 = arith.constant 0 : i32
    return %arg0, %c0_i32, %c0_i32_0, %c0_i32_1 : i32, i32, i32, i32
  }
}

</mosaic_0001>

<bundles_post_ra>
// kernel: tpu_custom_call.1
= control target key start
LH: loop header
LB: loop body
LE: loop exit
PB: predicated region body
PF: predicated region fallthrough
CT: control target
= control target key end

     0   :  { %s2339_s0 = inlined_call_operand.hbm [shape: f32[2,8,128], index: 0, kind: input, shape index: {}]   ;;  %s2340_s1 = inlined_call_operand.hbm [shape: f32[128,384], index: 1, kind: input, shape index: {}]   ;;  %s2341_s2 = inlined_call_operand.hbm [shape: f32[1,384], index: 2, kind: input, shape index: {}]   ;;  %s2342_s3 = inlined_call_operand.hbm [shape: f32[128,128], index: 3, kind: input, shape index: {}]   ;;  %s2343_s4 = inlined_call_operand.vmem [shape: f32[1,128], index: 4, kind: input, shape index: {}]   ;;  %s2344_s5 = inlined_call_operand.vmem [shape: f32[1,128], index: 5, kind: input, shape index: {}]   ;;  %s2345_s6 = inlined_call_operand.vmem [shape: f32[1,128], index: 6, kind: input, shape index: {}]   ;;  %s2346_s7 = inlined_call_operand.hbm [shape: f32[128,256], index: 7, kind: input, shape index: {}]   ;;  %s2347_s8 = inlined_call_operand.vmem [shape: f32[1,256], index: 8, kind: input, shape index: {}]   ;;  %s2348_s9 = inlined_call_operand.hbm [shape: f32[256,128], index: 9, kind: input, shape index: {}]   ;;  %s2349_s10 = inlined_call_operand.vmem [shape: f32[1,128], index: 10, kind: input, shape index: {}]   ;;  %s2350_s11 = inlined_call_operand.vmem [shape: f32[1,128], index: 11, kind: input, shape index: {}]   ;;  %s2351_s12 = inlined_call_operand.vmem [shape: f32[1,128], index: 12, kind: input, shape index: {}]   ;;  %s2352_s13 = inlined_call_operand.hbm [shape: f32[2,8,128], index: 13, kind: output, shape index: {0}]   ;;  %s2353_s14 = inlined_call_operand.hbm [shape: f32[2,4,8,8], index: 14, kind: output, shape index: {1}]  }
   0x1   :  { %2357 = sst [smem:[#allocation22_spill]] %s2339_s0 }
   0x2   :  { %2358 = sst [smem:[#allocation23_spill]] %s2340_s1 }
   0x3   :  { %2359 = sst [smem:[#allocation24_spill]] %s2341_s2 }
   0x4   :  { %2360 = sst [smem:[#allocation25_spill]] %s2342_s3 }
   0x5   :  { %2361 = sst [smem:[#allocation26_spill]] %s2343_s4 }
   0x6   :  { %2362 = sst [smem:[#allocation27_spill]] %s2346_s7 }
   0x7   :  { %2363 = sst [smem:[#allocation28_spill]] %s2350_s11 }
   0x8   :  { %2364 = sst [smem:[#allocation29_spill]] %s2351_s12 }
   0x9   :  { %2365 = sst [smem:[#allocation30_spill]] %s2352_s13 }
   0xa   :  { %2366 = sst [smem:[#allocation31_spill]] %s2353_s14 }
   0xb   :  { %20 = vsyncpa [#allocation3], 0 }
   0xc   :  { %22 = vsyncpa [#allocation3 + $0x1], 0 }
   0xd   :  { %23 = vsyncpa [#allocation6], 0 }
   0xe   :  { %24 = vsyncpa [#allocation9], 0 }
   0xf   :  { %25 = vsyncpa [#allocation12], 0 }
  0x10   :  { %26 = vsyncpa [#allocation4], 0 }
  0x11   :  { %28 = vsyncpa [#allocation4 + $0x1], 0 }
  0x12   :  { %29 = vsyncpa [#allocation15], 0 }
  0x13   :  { %31 = vsyncpa [#allocation15 + $0x1], 0  ;;  %s2052_s29 = smov 0   ;;  %s2054_s30 = smov 0  }
  0x14   :  { %s2056_s15 = smov 0   ;;  %s2058_s16 = smov 0  }
  0x15 LB: > { %s2367_s1 = sld [smem:[#allocation23_spill]]  ;;  %s2076_s20 = sadd.s32 4294967295, %s1958_s16   ;;  %s1958_s16 = sphi %s2058_s16, %s2388_s16   ;;  %s1954_s15 = sphi %s2056_s15, %s2387_s15   ;;  %s1950_s30 = sphi %s2054_s30, %s2386_s30   ;;  %s1946_s29 = sphi %s2052_s29, %s2385_s29  }
  0x16   : > { %p1485_p0 = scmp.ge.s32.totalorder %s1958_s16, 1  ;;  %p58_p1 = scmp.eq.s32.totalorder %s2076_s20, 0 }
  0x17   : > { %p372_p2 = scmp.lt.s32.totalorder %s1958_s16, 3  ;;  %s1960_s22 = smov [#allocation5]  }
  0x18   : > { %s385_s23 = sshll.u32 %s1960_s22, 4  ;;  %s2369_s3 = sld [smem:[#allocation25_spill]]  ;;  %s386_s23 = int_to_ptr.vmem [resolvable:$true] %s385_s23 }
  0x19   : > { %p2081_p3 = pnand %p1485_p0, %p372_p2  ;;  %s1961_s28 = smov [#allocation8]  }
  0x1a   : > { %s411_s17 = sshll.u32 %s1961_s28, 4  ;;  %s1962_s18 = smov 384   ;;  %s412_s17 = int_to_ptr.vmem [resolvable:$true] %s411_s17 }
  0x1b   : > { %s383_s19 = sshll.u32 %s2367_s1, 4  ;;  %p1552_p4 = pneg %p2081_p3  ;;  %s384_s19 = int_to_ptr.hbm [resolvable:$true] %s383_s19 }
  0x1c   : > { %s1963_s22 = smov 24   ;;  %s1964_s1 = smov 128  }
  0x1d   : > { %p2093_p6 = pnand %p1552_p4, %p58_p1  ;;  %s1965_s24 = smov 8  }
  0x1e   : > { %s409_s26 = sshll.u32 %s2369_s3, 4  ;;  %s2371_s2 = sld [smem:[#allocation24_spill]]  ;;  %s410_s26 = int_to_ptr.hbm [resolvable:$true] %s409_s26 }
  0x1f   : > { %1555 = dma.hbm_to_vmem [thread:$0]  (!%p2093_p6), %s384_s19, 6144, %s386_s23, [#allocation6], %s1962_s18, %s1962_s18, %s1963_s22  }
  0x20   : > { %1561 = dma.hbm_to_vmem [thread:$0]  (!%p2093_p6), %s410_s26, 2048, %s412_s17, [#allocation9], %s1964_s1, %s1964_s1, %s1965_s24  }
  0x21   : > { %s1966_s13 = smov [#allocation7]   ;;  %s2372_s7 = sld [smem:[#allocation27_spill]] }
  0x22   : > { %s400_s11 = sshll.u32 %s1966_s13, 4  ;;  %s1967_s23 = smov [#allocation10]   ;;  %s401_s11 = int_to_ptr.vmem [resolvable:$true] %s400_s11 }
  0x23   : > { %s434_s3 = sshll.u32 %s1967_s23, 4  ;;  %s1968_s13 = smov 256   ;;  %s435_s3 = int_to_ptr.vmem [resolvable:$true] %s434_s3 }
  0x24   : > { %s398_s12 = sshll.u32 %s2371_s2, 4  ;;  %s1969_s26 = smov 16   ;;  %s399_s12 = int_to_ptr.hbm [resolvable:$true] %s398_s12 }
  0x25   : > { %1558 = dma.hbm_to_vmem [thread:$0]  (!%p2093_p6), %s399_s12, 48, %s401_s11, [#allocation6]  }
  0x26   : > { %s449_s11 = sshll.u32 %s2348_s9, 4  ;;  %s1970_s12 = smov [#allocation11]   ;;  %s450_s11 = int_to_ptr.hbm [resolvable:$true] %s449_s11 }
  0x27   : > { %s432_s19 = sshll.u32 %s2372_s7, 4  ;;  %s451_s18 = sshll.u32 %s1970_s12, 4  ;;  %s433_s19 = int_to_ptr.hbm [resolvable:$true] %s432_s19  ;;  %s452_s18 = int_to_ptr.vmem [resolvable:$true] %s451_s18 }
  0x28   : > { %1564 = dma.hbm_to_vmem [thread:$0]  (!%p2093_p6), %s433_s19, 4096, %s435_s3, [#allocation9], %s1968_s13, %s1968_s13, %s1969_s26  }
  0x29   : > { %1567 = dma.hbm_to_vmem [thread:$0]  (!%p2093_p6), %s450_s11, 4096, %s452_s18, [#allocation12], %s1964_s1, %s1964_s1, %s1965_s24  }
  0x2a   : > { %s1484_s22 = sadd.s32 4294967294, %s1958_s16   ;;  %s2118_s25 = sadd.s32 1, %s1958_s16  }
  0x2b   : > { %s44_s28 = sadd.s32 1, %s1954_s15  ;;  %s41_s19 = ssub.s32 %s1958_s16, %s2118_s25 }
  0x2c   : > { %p51_p7 = scmp.ne.s32.totalorder %s1954_s15, %s1950_s30  ;;  %p42_p8 = scmp.eq.s32.totalorder %s41_s19, 0 }
  0x2d   : > { %p52_p9 = scmp.eq.s32.totalorder %s1958_s16, 0  ;;  %p57_p10 = scmp.ne.s32.totalorder %s1950_s30, %s1946_s29 }
  0x2e   : > { %p333_p11 = scmp.eq.s32.totalorder %s2076_s20, 1  ;;  %p339_p0 = scmp.eq.s32.totalorder %s1484_s22, 1 }
  0x2f   : > { %s2130_s23 = scalar_select %p42_p8, %s1954_s15, %s44_s28  }
  0x30   : > { %p2134_p12 = por %p58_p1, %p57_p10  ;;  %p2138_p13 = por %p333_p11, %p51_p7 }
  0x31   : > { %p53_p2 = por %p52_p9, %p51_p7  ;;  %s474_s24 = sand.u32 1, %s1954_s15  }
  0x32   : > { %p2143_p4 = por %p339_p0, %p57_p10  ;;  %p1584_p6 = scmp.lt.s32.totalorder %s1958_s16, 2 }
  0x33   : > { %s1492_s13 = sshll.u32 %s474_s24, 3  ;;  %s1493_s26 = sshll.u32 %s1958_s16, 3 }
  0x34   : > { %s2376_s0 = sld [smem:[#allocation22_spill]]  ;;  %s478_s18 = scalar_lea.vmem [#allocation2], %s1492_s13 }
  0x35   : > { %s486_s28 = sshll.u32 %s478_s18, 4  ;;  %p2152_p8 = pnand %p1584_p6, %p53_p2  ;;  %s487_s28 = int_to_ptr.vmem [resolvable:$true] %s486_s28 }
  0x36   : > { %s475_s19 = scalar_lea.sflag [#allocation3], %s474_s24 }
  0x37   : > { %p1822_p9 = pneg %p2152_p8 }
  0x3a   : > { %s482_s11 = scalar_lea.hbm %s2376_s0, %s1493_s26  ;;  %s1825_s13 = scalar_lea.hbm %s2376_s0, 16 }
  0x3b   : > { %s484_s12 = sshll.u32 %s482_s11, 4  ;;  %s485_s12 = int_to_ptr.hbm [resolvable:$true] %s484_s12 }
  0x3c   : > { %s1818_s2 = sshra.s32 %s485_s12, 4  ;;  %s1819_s2 = int_to_ptr.hbm [resolvable:$true] %s1818_s2 }
  0x3d   : > { %s1820_s7 = scalar_lea.hbm %s1819_s2, 8  ;;  %p1826_p0 = scmp.lt.s32.totalorder %s1819_s2, %s2376_s0 }
  0x3e   : > { %p1821_p7 = scmp.ne.s32.totalorder %s1819_s2, %s1820_s7  ;;  %p1827_p2 = scmp.lt.s32.totalorder %s1825_s13, %s1820_s7 }
  0x40   : > { %p1823_p10 = pnand %p1822_p9, %p1821_p7  ;;  %p1828_p6 = por %p1827_p2, %p1826_p0 }
  0x42   : > { %p1824_p11 = pneg %p1823_p10 }
  0x44   : > { %p1829_p5 = pnand %p1828_p6, %p1824_p11 }
  0x46   : > { %1832 = shalt.err (!%p1829_p5)
}
  0x47   : > { %1571 = dma.hbm_to_vmem [thread:$0]  (!%p2152_p8), %s485_s12, 128, %s487_s28, %s475_s19  }
  0x48   : > { %495 = sbr.rel (%p2081_p3) target bundleno = 2350 (0x92e), region = 72  ;;  %s2169_s24 = sand.u32 (!%p2081_p3), 1, %s1950_s30  }
  0x49   : > { %s2356_s18 = sshll.u32 (!%p2081_p3), %s2169_s24, 3  ;;  %s498_s26 = scalar_lea.sflag (!%p2081_p3), [#allocation3], %s2169_s24 }
  0x4a   : > { %s2175_s2 = scalar_lea.vmem (!%p2081_p3), [#allocation2], %s2356_s18 }
  0x4d   : > { %1921 = dma.done.wait (%p2134_p12), %s498_s26, 128  }
  0x4e   : > { %1923 = vsyncadd (%p2134_p12), %s498_s26, 4294967168 }
  0x4f   : > { %1925 = dma.done.wait (%p58_p1), [#allocation6], 6192  }
  0x50   : > { %1927 = vsyncadd (%p58_p1), [#allocation6], 4294961104 }
  0x51   : > { %1929 = dma.done.wait (%p58_p1), [#allocation9], 6144  }
  0x52   : > { %1931 = vsyncadd (%p58_p1), [#allocation9], 4294961152 }
  0x53   : > { %1933 = dma.done.wait (%p58_p1), [#allocation12], 4096  }
  0x54   : > { %1935 = vsyncadd (%p58_p1), [#allocation12], 4294963200  ;;  %v624_v0 = vld [vmem:[#allocation5 + $0x170] sm:$0xff]  ;;  %v625_v1 = vld [vmem:[#allocation5 + $0x178] sm:$0xff]  ;;  %vm695_vm0 = vcmask 261120   ;;  %s1971_s7 = smov 96  }
  0x55   : > { %v623_v2 = vld [vmem:[#allocation5 + $0x168] sm:$0xff]  ;;  %654 = vmatpush.msra.mxu1 %v624_v0  ;;  %674 = vmatpush.msra.mxu2 %v625_v1  ;;  %v621_v3 = vld [vmem:[#allocation5 + $0x158] sm:$0xff]  ;;  %v622_v4 = vld [vmem:[#allocation5 + $0x160] sm:$0xff]  ;;  %s1972_s21 = smov 64   ;;  %s1973_s27 = smov 32   ;;  %vm722_vm1 = vcmask 64512  }
  0x56   : > { %v620_v5 = vld [vmem:[#allocation5 + $0x150] sm:$0xff]  ;;  %634 = vmatpush.msra.mxu0 %v623_v2  ;;  %v618_v6 = vld [vmem:[#allocation5 + $0x140] sm:$0xff]  ;;  %v619_v7 = vld [vmem:[#allocation5 + $0x148] sm:$0xff]  ;;  %s1502_s12 = sshll.u32 %s2169_s24, 5  ;;  %s2378_s4 = sld [smem:[#allocation26_spill]] }
  0x57   : > { %655 = vmatpush.msra.mxu1 %v621_v3  ;;  %675 = vmatpush.msra.mxu2 %v622_v4  ;;  %v617_v8 = vld [vmem:[#allocation5 + $0x138] sm:$0xff]  ;;  %v615_v9 = vld [vmem:[#allocation5 + $0x128] sm:$0xff]  ;;  %v616_v10 = vld [vmem:[#allocation5 + $0x130] sm:$0xff]  ;;  %s2230_s28 = scalar_lea.vmem [#allocation14], %s1502_s12  ;;  %s2379_s19 = sld [smem:[#allocation31_spill]] }
  0x58   : > { %635 = vmatpush.msra.mxu0 %v620_v5  ;;  %v614_v11 = vld [vmem:[#allocation5 + $0x120] sm:$0xff]  ;;  %v612_v12 = vld [vmem:[#allocation5 + $0x110] sm:$0xff]  ;;  %v613_v13 = vld [vmem:[#allocation5 + $0x118] sm:$0xff]  ;;  %s1327_s13 = sshll.u32 %s2230_s28, 4  ;;  %s1301_s11 = scalar_lea.sflag [#allocation15], %s2169_s24  ;;  %s1328_s13 = int_to_ptr.vmem [resolvable:$true] %s1327_s13 }
  0x59   : > { %656 = vmatpush.msra.mxu1 %v618_v6  ;;  %676 = vmatpush.msra.mxu2 %v619_v7  ;;  %v611_v14 = vld [vmem:[#allocation5 + $0x108] sm:$0xff]  ;;  %v609_v15 = vld [vmem:[#allocation5 + $0xf8] sm:$0xff]  ;;  %v610_v16 = vld [vmem:[#allocation5 + $0x100] sm:$0xff] }
  0x5a   : > { %636 = vmatpush.msra.mxu0 %v617_v8  ;;  %v608_v17 = vld [vmem:[#allocation5 + $0xf0] sm:$0xff]  ;;  %v606_v18 = vld [vmem:[#allocation5 + $0xe0] sm:$0xff]  ;;  %v607_v19 = vld [vmem:[#allocation5 + $0xe8] sm:$0xff] }
  0x5b   : > { %657 = vmatpush.msra.mxu1 %v615_v9  ;;  %677 = vmatpush.msra.mxu2 %v616_v10  ;;  %v605_v20 = vld [vmem:[#allocation5 + $0xd8] sm:$0xff]  ;;  %v603_v21 = vld [vmem:[#allocation5 + $0xc8] sm:$0xff]  ;;  %v604_v22 = vld [vmem:[#allocation5 + $0xd0] sm:$0xff] }
  0x5c   : > { %637 = vmatpush.msra.mxu0 %v614_v11  ;;  %v602_v23 = vld [vmem:[#allocation5 + $0xc0] sm:$0xff]  ;;  %v600_v24 = vld [vmem:[#allocation5 + $0xb0] sm:$0xff]  ;;  %v601_v25 = vld [vmem:[#allocation5 + $0xb8] sm:$0xff] }
  0x5d   : > { %658 = vmatpush.msra.mxu1 %v612_v12  ;;  %678 = vmatpush.msra.mxu2 %v613_v13  ;;  %v599_v26 = vld [vmem:[#allocation5 + $0xa8] sm:$0xff]  ;;  %v597_v27 = vld [vmem:[#allocation5 + $0x98] sm:$0xff]  ;;  %v598_v28 = vld [vmem:[#allocation5 + $0xa0] sm:$0xff]  ;;  %s1868_s18 = scalar_lea.hbm %s2379_s19, 64 }
  0x5e   : > { %638 = vmatpush.msra.mxu0 %v611_v14  ;;  %v596_v29 = vld [vmem:[#allocation5 + $0x90] sm:$0xff]  ;;  %v594_v30 = vld [vmem:[#allocation5 + $0x80] sm:$0xff]  ;;  %v595_v31 = vld [vmem:[#allocation5 + $0x88] sm:$0xff] }
  0x5f   : > { %659 = vmatpush.msra.mxu1 %v609_v15  ;;  %679 = vmatpush.msra.mxu2 %v610_v16  ;;  %v593_v32 = vld [vmem:[#allocation5 + $0x78] sm:$0xff]  ;;  %v591_v33 = vld [vmem:[#allocation5 + $0x68] sm:$0xff]  ;;  %v592_v34 = vld [vmem:[#allocation5 + $0x70] sm:$0xff] }
  0x60   : > { %639 = vmatpush.msra.mxu0 %v608_v17  ;;  %v590_v35 = vld [vmem:[#allocation5 + $0x60] sm:$0xff]  ;;  %v588_v36 = vld [vmem:[#allocation5 + $0x50] sm:$0xff]  ;;  %v589_v37 = vld [vmem:[#allocation5 + $0x58] sm:$0xff] }
  0x61   : > { %660 = vmatpush.msra.mxu1 %v606_v18  ;;  %680 = vmatpush.msra.mxu2 %v607_v19  ;;  %v587_v38 = vld [vmem:[#allocation5 + $0x48] sm:$0xff]  ;;  %v585_v39 = vld [vmem:[#allocation5 + $0x38] sm:$0xff]  ;;  %v586_v40 = vld [vmem:[#allocation5 + $0x40] sm:$0xff] }
  0x62   : > { %640 = vmatpush.msra.mxu0 %v605_v20  ;;  %v584_v41 = vld [vmem:[#allocation5 + $0x30] sm:$0xff]  ;;  %v582_v42 = vld [vmem:[#allocation5 + $0x20] sm:$0xff]  ;;  %v583_v43 = vld [vmem:[#allocation5 + $0x28] sm:$0xff] }
  0x63   : > { %661 = vmatpush.msra.mxu1 %v603_v21  ;;  %681 = vmatpush.msra.mxu2 %v604_v22  ;;  %v581_v44 = vld [vmem:[#allocation5 + $0x18] sm:$0xff]  ;;  %v579_v45 = vld [vmem:[#allocation5 + $0x8] sm:$0xff]  ;;  %v580_v46 = vld [vmem:[#allocation5 + $0x10] sm:$0xff] }
  0x64   : > { %641 = vmatpush.msra.mxu0 %v602_v23  ;;  %v578_v47 = vld [vmem:[#allocation5] sm:$0xff]  ;;  %v2194_v48 = vld [vmem:[%s2175_s2] sm:$0xff] }
  0x65   : > { %662 = vmatpush.msra.mxu1 %v600_v24  ;;  %682 = vmatpush.msra.mxu2 %v601_v25  ;;  %v626_v49 = vld [vmem:[#allocation7] sm:$0x7] }
  0x66   : > { %642 = vmatpush.msra.mxu0 %v599_v26  ;;  %v629_v50 = vperm.slane %v626_v49, 1  ;;  %v628_v51 = vperm.slane %v626_v49, 0  ;;  %v630_v57 = vperm.slane %v626_v49, 2 }
  0x67   : > { %663 = vmatpush.msra.mxu1 %v597_v27  ;;  %683 = vmatpush.msra.mxu2 %v598_v28 }
  0x68   : > { %643 = vmatpush.msra.mxu0 %v596_v29 }
  0x69   : > { %664 = vmatpush.msra.mxu1 %v594_v30  ;;  %684 = vmatpush.msra.mxu2 %v595_v31 }
  0x6a   : > { %644 = vmatpush.msra.mxu0 %v593_v32 }
  0x6b   : > { %665 = vmatpush.msra.mxu1 %v591_v33  ;;  %685 = vmatpush.msra.mxu2 %v592_v34 }
  0x6c   : > { %645 = vmatpush.msra.mxu0 %v590_v35 }
  0x6d   : > { %666 = vmatpush.msra.mxu1 %v588_v36  ;;  %686 = vmatpush.msra.mxu2 %v589_v37 }
  0x6e   : > { %646 = vmatpush.msra.mxu0 %v587_v38 }
  0x6f   : > { %667 = vmatpush.msra.mxu1 %v585_v39  ;;  %687 = vmatpush.msra.mxu2 %v586_v40 }
  0x70   : > { %647 = vmatpush.msra.mxu0 %v584_v41 }
  0x71   : > { %668 = vmatpush.msra.mxu1 %v582_v42  ;;  %688 = vmatpush.msra.mxu2 %v583_v43 }
  0x72   : > { %648 = vmatpush.msra.mxu0 %v581_v44 }
  0x73   : > { %669 = vmatpush.msra.mxu1 %v579_v45  ;;  %689 = vmatpush.msra.mxu2 %v580_v46 }
  0x74   : > { %649 = vmatpush.msra.mxu0 %v578_v47  ;;  %670 = vmatmul.f32.vlgmr.msra.gmra.mxu1 %v2194_v48 }
  0x75   : > { %690 = vmatmul.f32.vlgmr.msra.gmra.mxu2 %v2194_v48  ;;  %650 = vmatmul.f32.vlgmr.msra.gmra.mxu0 %v2194_v48 }
  0xf1   : > { %v671_v52 = vpop.f32.mrf.mxu1 }
  0xf2   : > { %v672_v53 = vadd.f32 %v671_v52, %v629_v50  ;;  %v651_v54 = vpop.f32.mrf.mxu0 }
  0xf3   : > { %v652_v55 = vadd.f32 %v651_v54, %v628_v51 }
  0xf4   : > { %773 = vrot.lane.b32.xlu0 %v672_v53, %s1971_s7  ;;  %1503 = vmatpush.xpose.msk.msrb.mxu0 %vm695_vm0, %v672_v53 }
  0xf5   : > { %v2201_v56 = vmul.f32 0.17677669, %v652_v55 }
  0xf7   : > { %1504 = vmatmul.msk.f32.vlgmr.msrb.gmra.mxu0 %vm695_vm0, %v2201_v56 }
  0xf8   : > { %v691_v58 = vpop.f32.mrf.mxu2 }
  0xf9   : > { %v2205_v59 = vadd.f32 %v691_v58, %v630_v57 }
  0xfb   : > { %826 = vrot.lane.b32.xlu2 %v2205_v59, %s1971_s7  ;;  %766 = vmatpush.msrb.mxu2 %v2205_v59 }
  0xfc   : > { %771 = vrot.lane.b32.xlu0 %v2201_v56, %s1971_s7 }
 0x103   : > { %854 = vrot.lane.b32.xlu2 %v672_v53, %s1972_s21 }
 0x104   : > { %934 = vrot.lane.b32.xlu0 %v672_v53, %s1973_s27 }
 0x10b   : > { %932 = vrot.lane.b32.xlu2 %v2201_v56, %s1973_s27 }
 0x155   : > { %v827_v60 = vpop.permute.xlu2 %826 }
 0x156   : > { %847 = vmatpush.msra.mxu3 %v827_v60 }
 0x15d   : > { %v855_v61 = vpop.permute.xlu2 %854 }
 0x15e   : > { %1510 = vmatpush.xpose.msk.msrb.mxu3 %vm695_vm0, %v855_v61 }
 0x165   : > { %v933_v3 = vpop.permute.xlu2 %932 }
 0x166   : > { %v774_v62 = vpop.permute.xlu0 %773 }
 0x167   : > { %1506 = vmatpush.xpose.msk.msrb.mxu1 %vm695_vm0, %v774_v62 }
 0x16e   : > { %v772_v63 = vpop.permute.xlu0 %771 }
 0x16f   : > { %1507 = vmatmul.msk.f32.vlgmr.msrb.gmra.mxu1 %vm695_vm0, %v772_v63 }
 0x174   : > { %v719_v0 = vpop.f32.mrf.mxu0 }
 0x175   : > { %v723_v1 = vsel %vm722_vm1, %v719_v0, -inf }
 0x176   : > { %v935_v2 = vpop.permute.xlu0 %934  ;;  %724 = vmax.xlane.f32.xlu0 %v723_v1 }
 0x177   : > { %1514 = vmatpush.xpose.msk.msra.mxu1 %vm695_vm0, %v935_v2 }
 0x17a   : > { %1515 = vmatmul.msk.f32.vlgmr.msra.gmra.mxu1 %vm695_vm0, %v933_v3 }
 0x1e9   : > { %v725_v4 = vpop.xlane.xlu0 %724 }
 0x1ea   : > { %v726_v7 = vsub.f32 %v719_v0, %v725_v4 }
 0x1ec   : > { %v796_v5 = vpop.f32.mrf.mxu1  ;;  %v727_v8 = vmul.f32 1.442695, %v726_v7 }
 0x1ed   : > { %v799_v6 = vsel %vm722_vm1, %v796_v5, -inf }
 0x1ee   : > { %800 = vmax.xlane.f32.xlu1 %v799_v6  ;;  %1646 = vpow2.f32 %v727_v8 }
 0x1f4   : > { %v1647_v11 = vpop.eup %1646 }
 0x1f5   : > { %v729_v12 = vsel %vm722_vm1, %v1647_v11, 0.0 }
 0x1f7   : > { %v957_v9 = vpop.f32.mrf.mxu1 }
 0x1f8   : > { %v960_v10 = vsel %vm722_vm1, %v957_v9, -inf }
 0x1f9   : > { %961 = vmax.xlane.f32.xlu2 %v960_v10 }
 0x201   : > { %730 = vadd.xlane.f32.xlu2 %v729_v12 }
 0x261   : > { %v801_v13 = vpop.xlane.xlu1 %800 }
 0x262   : > { %v802_v14 = vsub.f32 %v796_v5, %v801_v13 }
 0x264   : > { %v803_v15 = vmul.f32 1.442695, %v802_v14 }
 0x266   : > { %1648 = vpow2.f32 %v803_v15 }
 0x26c   : > { %v1649_v16 = vpop.eup %1648  ;;  %v962_v17 = vpop.xlane.xlu2 %961 }
 0x26d   : > { %v963_v18 = vsub.f32 %v957_v9, %v962_v17  ;;  %v805_v19 = vsel %vm722_vm1, %v1649_v16, 0.0 }
 0x26e   : > { %806 = vadd.xlane.f32.xlu1 %v805_v19  ;;  %v1044_v19 = vld [vmem:[#allocation8 + $0x78] sm:$0xff] }
 0x26f   : > { %v964_v20 = vmul.f32 1.442695, %v963_v18 }
 0x271   : > { %1650 = vpow2.f32 %v964_v20  ;;  %v1043_v20 = vld [vmem:[#allocation8 + $0x70] sm:$0xff] }
 0x274   : > { %v731_v21 = vpop.xlane.xlu2 %730 }
 0x275   : > { %1652 = vrcp.f32 %v731_v21  ;;  %v743_v27 = vand.u32 2147483648, %v731_v21  ;;  %v741_v29 = vand.u32 2147483647, %v731_v21  ;;  %vm737_vm3 = vweird.f32 %v731_v21 }
 0x277   : > { %v1651_v22 = vpop.eup %1650  ;;  %v744_v31 = vor.u32 1.1754944e-38, %v743_v27  ;;  %vm742_vm5 = vcmp.eq.f32.partialorder %v741_v29, 8.507059e+37  ;;  %v1036_v27 = vld [vmem:[#allocation8 + $0x38] sm:$0xff]  ;;  %v1034_v29 = vld [vmem:[#allocation8 + $0x28] sm:$0xff] }
 0x278   : > { %v966_v23 = vsel %vm722_vm1, %v1651_v22, 0.0 }
 0x279   : > { %967 = vadd.xlane.f32.xlu0 %v966_v23  ;;  %v1040_v23 = vld [vmem:[#allocation8 + $0x58] sm:$0xff] }
 0x27b   : > { %v1653_v24 = vpop.eup %1652 }
 0x27c   : > { %v733_v25 = vmul.f32 %v1653_v24, %v731_v21  ;;  %vm738_vm2 = vweird.f32 %v1653_v24  ;;  %v1042_v21 = vld [vmem:[#allocation8 + $0x68] sm:$0xff] }
 0x27d   : > { %vm739_vm4 = vmor %vm737_vm3, %vm738_vm2 }
 0x27e   : > { %v734_v26 = vsub.f32 1.0, %v733_v25  ;;  %v1038_v25 = vld [vmem:[#allocation8 + $0x48] sm:$0xff] }
 0x280   : > { %v735_v28 = vmul.f32 %v1653_v24, %v734_v26  ;;  %v1037_v26 = vld [vmem:[#allocation8 + $0x40] sm:$0xff] }
 0x282   : > { %v736_v30 = vadd.f32 %v1653_v24, %v735_v28  ;;  %v1035_v28 = vld [vmem:[#allocation8 + $0x30] sm:$0xff] }
 0x284   : > { %v740_v32 = vsel %vm739_vm4, %v1653_v24, %v736_v30  ;;  %v1039_v24 = vld [vmem:[#allocation8 + $0x50] sm:$0xff]  ;;  %vm1027_vm4 = vcmask 785408  }
 0x285   : > { %v745_v33 = vsel %vm742_vm5, %v744_v31, %v740_v32 }
 0x286   : > { %v746_v34 = vmul.f32 %v1647_v11, %v745_v33  ;;  %v1033_v33 = vld [vmem:[#allocation8 + $0x20] sm:$0xff] }
 0x287   : > { %852 = vrot.lane.b32.xlu1 %v2201_v56, %s1972_s21 }
 0x288   : > { %747 = vst.msk [vmem:[%s2230_s28] sm:$0xff] %vm722_vm1, %v746_v34  ;;  %1505 = vmatmul.msk.f32.vlgmr.msrb.gmra.mxu2 %vm722_vm1, %v746_v34  ;;  %v1032_v34 = vld [vmem:[#allocation8 + $0x18] sm:$0xff] }
 0x28d   : > { %986 = vrot.lane.b32.xlu0 %v2205_v59, %s1973_s27 }
 0x2e1   : > { %v807_v35 = vpop.xlane.xlu1 %806 }
 0x2e2   : > { %1654 = vrcp.f32 %v807_v35  ;;  %v819_v39 = vand.u32 2147483648, %v807_v35  ;;  %v817_v42 = vand.u32 2147483647, %v807_v35  ;;  %vm813_vm7 = vweird.f32 %v807_v35 }
 0x2e4   : > { %v820_v44 = vor.u32 1.1754944e-38, %v819_v39  ;;  %vm818_vm9 = vcmp.eq.f32.partialorder %v817_v42, 8.507059e+37 }
 0x2e8   : > { %v1655_v36 = vpop.eup %1654 }
 0x2e9   : > { %v809_v37 = vmul.f32 %v1655_v36, %v807_v35  ;;  %vm814_vm6 = vweird.f32 %v1655_v36  ;;  %v1031_v35 = vld [vmem:[#allocation8 + $0x10] sm:$0xff] }
 0x2ea   : > { %vm815_vm8 = vmor %vm813_vm7, %vm814_vm6 }
 0x2eb   : > { %v810_v38 = vsub.f32 1.0, %v809_v37  ;;  %v1029_v37 = vld [vmem:[#allocation8] sm:$0xff] }
 0x2ec   : > { %v968_v40 = vpop.xlane.xlu0 %967 }
 0x2ed   : > { %v811_v41 = vmul.f32 %v1655_v36, %v810_v38  ;;  %1656 = vrcp.f32 %v968_v40  ;;  %v980_v52 = vand.u32 2147483648, %v968_v40  ;;  %v978_v54 = vand.u32 2147483647, %v968_v40 }
 0x2ee   : > { %vm974_vm11 = vweird.f32 %v968_v40 }
 0x2ef   : > { %v812_v43 = vadd.f32 %v1655_v36, %v811_v41  ;;  %v981_v56 = vor.u32 1.1754944e-38, %v980_v52  ;;  %vm979_vm13 = vcmp.eq.f32.partialorder %v978_v54, 8.507059e+37  ;;  %v1135_v52 = vld [vmem:[#allocation10 + $0xe0] sm:$0xff] }
 0x2f1   : > { %v816_v45 = vsel %vm815_vm8, %v1655_v36, %v812_v43  ;;  %v1030_v36 = vld [vmem:[#allocation8 + $0x8] sm:$0xff] }
 0x2f2   : > { %v821_v46 = vsel %vm818_vm9, %v820_v44, %v816_v45  ;;  %v1640_v44 = vld [vmem:[%s2378_s4] ss:$0 sm:$0xff] }
 0x2f3   : > { %v1657_v47 = vpop.eup %1656  ;;  %v822_v49 = vmul.f32 %v1649_v16, %v821_v46 }
 0x2f4   : > { %v970_v50 = vmul.f32 %v1657_v47, %v968_v40  ;;  %vm975_vm10 = vweird.f32 %v1657_v47 }
 0x2f5   : > { %1508 = vst.msk [vmem:[%s2230_s28 + $0x8] sm:$0xff] %vm722_vm1, %v822_v49  ;;  %1509 = vmatmul.msk.f32.vlgmr.msra.gmra.mxu3 %vm722_vm1, %v822_v49  ;;  %vm976_vm12 = vmor %vm974_vm11, %vm975_vm10  ;;  %v1974_v49 = vmov 128.0  }
 0x2f6   : > { %v971_v51 = vsub.f32 1.0, %v970_v50  ;;  %1049 = vmatpush.msra.mxu3 %v1044_v19  ;;  %v1137_v50 = vld [vmem:[#allocation10 + $0xf0] sm:$0xff] }
 0x2f7   : > { %v1113_v19 = vld [vmem:[#allocation10 + $0x30] sm:$0xff] }
 0x2f8   : > { %v972_v53 = vmul.f32 %v1657_v47, %v971_v51  ;;  %1050 = vmatpush.msra.mxu3 %v1043_v20  ;;  %v1138_v51 = vld [vmem:[#allocation10 + $0xf8] sm:$0xff] }
 0x2f9   : > { %v853_v58 = vpop.permute.xlu1 %852  ;;  %1165 = vmatpush.msrb.mxu1 %v1138_v51  ;;  %v1114_v20 = vld [vmem:[#allocation10 + $0x38] sm:$0xff]  ;;  %v1193_v51 = vld [vmem:[#allocation11 + $0x30] sm:$0xff] }
 0x2fa   : > { %v973_v55 = vadd.f32 %v1657_v47, %v972_v53  ;;  %1051 = vmatpush.msra.mxu3 %v1042_v21  ;;  %v1136_v53 = vld [vmem:[#allocation10 + $0xe8] sm:$0xff]  ;;  %v1111_v21 = vld [vmem:[#allocation10 + $0x20] sm:$0xff] }
 0x2fb   : > { %1166 = vmatpush.msrb.mxu1 %v1136_v53 }
 0x2fc   : > { %v977_v57 = vsel %vm976_vm12, %v1657_v47, %v973_v55 }
 0x2fd   : > { %v982_v60 = vsel %vm979_vm13, %v981_v56, %v977_v57  ;;  %1511 = vmatmul.msk.f32.vlgmr.msrb.gmra.mxu3 %vm695_vm0, %v853_v58 }
 0x2fe   : > { %v983_v61 = vmul.f32 %v1651_v22, %v982_v60  ;;  %v1041_v22 = vld [vmem:[#allocation8 + $0x60] sm:$0xff] }
 0x2ff   : > { %v987_v62 = vpop.permute.xlu0 %986  ;;  %1052 = vmatpush.msra.mxu3 %v1041_v22  ;;  %v1112_v22 = vld [vmem:[#allocation10 + $0x28] sm:$0xff] }
 0x300   : > { %1007 = vmatpush.msra.mxu2 %v987_v62  ;;  %1516 = vst.msk [vmem:[%s2230_s28 + $0x18] sm:$0xff] %vm722_vm1, %v983_v61 }
 0x301   : > { %1517 = vmatmul.msk.f32.vlgmr.msra.gmra.mxu2 %vm722_vm1, %v983_v61  ;;  %1053 = vmatpush.msra.mxu3 %v1040_v23  ;;  %v1109_v23 = vld [vmem:[#allocation10 + $0x10] sm:$0xff] }
 0x303   : > { %1054 = vmatpush.msra.mxu3 %v1039_v24  ;;  %v1110_v24 = vld [vmem:[#allocation10 + $0x18] sm:$0xff] }
 0x305   : > { %1055 = vmatpush.msra.mxu3 %v1038_v25  ;;  %v1107_v25 = vld [vmem:[#allocation10] sm:$0xff] }
 0x307   : > { %1056 = vmatpush.msra.mxu3 %v1037_v26  ;;  %v1108_v26 = vld [vmem:[#allocation10 + $0x8] sm:$0xff] }
 0x309   : > { %1057 = vmatpush.msra.mxu3 %v1036_v27  ;;  %v1202_v27 = vld [vmem:[#allocation11 + $0x78] sm:$0xff] }
 0x30a   : > { %1223 = vmatpush.msrb.mxu2 %v1202_v27 }
 0x30b   : > { %1058 = vmatpush.msra.mxu3 %v1035_v28  ;;  %v768_v30 = vpop.f32.mrf.mxu2  ;;  %v1218_v28 = vld [vmem:[#allocation11 + $0xf8] sm:$0xff] }
 0x30d   : > { %1059 = vmatpush.msra.mxu3 %v1034_v29  ;;  %v1201_v29 = vld [vmem:[#allocation11 + $0x70] sm:$0xff] }
 0x30e   : > { %1224 = vmatpush.msrb.mxu2 %v1201_v29 }
 0x30f   : > { %1060 = vmatpush.msra.mxu3 %v1033_v33 }
 0x311   : > { %1061 = vmatpush.msra.mxu3 %v1032_v34 }
 0x313   : > { %1062 = vmatpush.msra.mxu3 %v1031_v35  ;;  %v1199_v35 = vld [vmem:[#allocation11 + $0x60] sm:$0xff] }
 0x315   : > { %1063 = vmatpush.msra.mxu3 %v1030_v36  ;;  %v1215_v36 = vld [vmem:[#allocation11 + $0xe0] sm:$0xff] }
 0x317   : > { %1064 = vmatpush.msra.mxu3 %v1029_v37 }
 0x319   : > { %1243 = vmatpush.msrb.mxu3 %v1218_v28 }
 0x378   : > { %v849_v63 = vpop.f32.mrf.mxu3 }
 0x380   : > { %v877_v0 = vpop.f32.mrf.mxu3 }
 0x381   : > { %v880_v1 = vsel %vm722_vm1, %v877_v0, -inf }
 0x382   : > { %881 = vmax.xlane.f32.xlu1 %v880_v1  ;;  %v1134_v1 = vld [vmem:[#allocation10 + $0xd8] sm:$0xff] }
 0x383   : > { %1167 = vmatpush.msrb.mxu1 %v1134_v1  ;;  %v1641_v1 = vld [vmem:[%s2344_s5] ss:$0 sm:$0xff] }
 0x384   : > { %v1009_v32 = vpop.f32.mrf.mxu2 }
 0x39b   : > { %1013 = vrot.lane.b32.xlu1 %v849_v63, %s1973_s27  ;;  %s1525_s27 = sshll.u32 %s2076_s20, 5 }
 0x39c   : > { %s1326_s14 = scalar_lea.hbm %s2379_s19, %s1525_s27 }
 0x39d   : > { %s1329_s17 = sshll.u32 %s1326_s14, 4  ;;  %s1330_s17 = int_to_ptr.hbm [resolvable:$true] %s1329_s17 }
 0x39e   : > { %s1862_s26 = sshra.s32 %s1330_s17, 4  ;;  %s1863_s26 = int_to_ptr.hbm [resolvable:$true] %s1862_s26 }
 0x39f   : > { %s1864_s2 = scalar_lea.hbm %s1863_s26, 32  ;;  %p1869_p12 = scmp.lt.s32.totalorder %s1863_s26, %s2379_s19 }
 0x3a0   : > { %p1865_p1 = scmp.ne.s32.totalorder %s1863_s26, %s1864_s2  ;;  %p1870_p8 = scmp.lt.s32.totalorder %s1868_s18, %s1864_s2 }
 0x3a2   : > { %p1866_p3 = pnand %p1865_p1, %p2138_p13  ;;  %p1871_p7 = por %p1870_p8, %p1869_p12 }
 0x3a4   : > { %p1867_p5 = pneg %p1866_p3 }
 0x3a6   : > { %p1872_p9 = pnand %p1871_p7, %p1867_p5 }
 0x3f5   : > { %v882_v2 = vpop.xlane.xlu1 %881 }
 0x3f6   : > { %v883_v3 = vsub.f32 %v877_v0, %v882_v2  ;;  %v1133_v0 = vld [vmem:[#allocation10 + $0xd0] sm:$0xff]  ;;  %v1131_v2 = vld [vmem:[#allocation10 + $0xc0] sm:$0xff] }
 0x3f8   : > { %v884_v4 = vmul.f32 1.442695, %v883_v3  ;;  %v1132_v3 = vld [vmem:[#allocation10 + $0xc8] sm:$0xff] }
 0x3f9   : > { %1168 = vmatpush.msrb.mxu1 %v1132_v3 }
 0x3fa   : > { %1658 = vpow2.f32 %v884_v4  ;;  %v1129_v4 = vld [vmem:[#allocation10 + $0xb0] sm:$0xff] }
 0x400   : > { %v1659_v5 = vpop.eup %1658 }
 0x401   : > { %v886_v6 = vsel %vm722_vm1, %v1659_v5, 0.0 }
 0x402   : > { %887 = vadd.xlane.f32.xlu2 %v886_v6  ;;  %v1127_v6 = vld [vmem:[#allocation10 + $0xa0] sm:$0xff] }
 0x40d   : > { %v1014_v39 = vpop.permute.xlu1 %1013 }
 0x40e   : > { %v1024_v40 = vsel %vm695_vm0, %v768_v30, %v1014_v39  ;;  %v1217_v30 = vld [vmem:[#allocation11 + $0xf0] sm:$0xff]  ;;  %v1214_v39 = vld [vmem:[#allocation11 + $0xd8] sm:$0xff] }
 0x40f   : > { %1244 = vmatpush.msrb.mxu3 %v1217_v30 }
 0x41a   : > { %906 = vrot.lane.b32.xlu2 %v2205_v59, %s1972_s21 }
 0x475   : > { %v888_v7 = vpop.xlane.xlu2 %887 }
 0x476   : > { %1660 = vrcp.f32 %v888_v7  ;;  %v900_v12 = vand.u32 2147483648, %v888_v7  ;;  %v898_v14 = vand.u32 2147483647, %v888_v7  ;;  %vm894_vm15 = vweird.f32 %v888_v7 }
 0x477   : > { %1662 = vrcp.f32 %v1974_v49  ;;  %v1210_v49 = vld [vmem:[#allocation11 + $0xb8] sm:$0xff] }
 0x478   : > { %v901_v16 = vor.u32 1.1754944e-38, %v900_v12  ;;  %vm899_vm3 = vcmp.eq.f32.partialorder %v898_v14, 8.507059e+37  ;;  %v1121_v12 = vld [vmem:[#allocation10 + $0x70] sm:$0xff]  ;;  %v1119_v14 = vld [vmem:[#allocation10 + $0x60] sm:$0xff] }
 0x47c   : > { %v1661_v8 = vpop.eup %1660 }
 0x47d   : > { %v890_v9 = vmul.f32 %v1661_v8, %v888_v7  ;;  %v907_v10 = vpop.permute.xlu2 %906  ;;  %vm895_vm14 = vweird.f32 %v1661_v8  ;;  %v1663_v54 = vpop.eup %1662  ;;  %v1128_v7 = vld [vmem:[#allocation10 + $0xa8] sm:$0xff] }
 0x47e   : > { %927 = vmatpush.msra.mxu0 %v907_v10  ;;  %vm896_vm2 = vmor %vm894_vm15, %vm895_vm14  ;;  %v1075_v55 = vmul.f32 128.0, %v1663_v54  ;;  %vm1079_vm0 = vweird.f32 %v1663_v54  ;;  %v1123_v10 = vld [vmem:[#allocation10 + $0x80] sm:$0xff] }
 0x47f   : > { %v891_v11 = vsub.f32 1.0, %v890_v9  ;;  %v1126_v9 = vld [vmem:[#allocation10 + $0x98] sm:$0xff] }
 0x480   : > { %1145 = vmatpush.msrb.mxu0 %v1137_v50  ;;  %v1076_v56 = vsub.f32 1.0, %v1075_v55  ;;  %v1208_v55 = vld [vmem:[#allocation11 + $0xa8] sm:$0xff] }
 0x481   : > { %v892_v13 = vmul.f32 %v1661_v8, %v891_v11  ;;  %v1124_v11 = vld [vmem:[#allocation10 + $0x88] sm:$0xff] }
 0x482   : > { %1146 = vmatpush.msrb.mxu0 %v1135_v52  ;;  %v1077_v57 = vmul.f32 %v1663_v54, %v1076_v56  ;;  %v1209_v52 = vld [vmem:[#allocation11 + $0xb0] sm:$0xff] }
 0x483   : > { %v893_v15 = vadd.f32 %v1661_v8, %v892_v13  ;;  %v1122_v13 = vld [vmem:[#allocation10 + $0x78] sm:$0xff] }
 0x484   : > { %v1078_v58 = vadd.f32 %v1663_v54, %v1077_v57  ;;  %1147 = vmatpush.msrb.mxu0 %v1133_v0  ;;  %v1191_v57 = vld [vmem:[#allocation11 + $0x20] sm:$0xff] }
 0x485   : > { %v897_v17 = vsel %vm896_vm2, %v1661_v8, %v893_v15  ;;  %v1125_v8 = vld [vmem:[#allocation10 + $0x90] sm:$0xff]  ;;  %v1120_v15 = vld [vmem:[#allocation10 + $0x68] sm:$0xff] }
 0x486   : > { %v902_v18 = vsel %vm899_vm3, %v901_v16, %v897_v17  ;;  %v2259_v60 = vsel %vm1079_vm0, %v1663_v54, %v1078_v58  ;;  %1148 = vmatpush.msrb.mxu0 %v1131_v2  ;;  %v1117_v16 = vld [vmem:[#allocation10 + $0x50] sm:$0xff]  ;;  %v1118_v17 = vld [vmem:[#allocation10 + $0x58] sm:$0xff]  ;;  %v1192_v54 = vld [vmem:[#allocation11 + $0x28] sm:$0xff] }
 0x487   : > { %v903_v59 = vmul.f32 %v1659_v5, %v902_v18  ;;  %v1130_v5 = vld [vmem:[#allocation10 + $0xb8] sm:$0xff]  ;;  %v1115_v18 = vld [vmem:[#allocation10 + $0x40] sm:$0xff] }
 0x488   : > { %1149 = vmatpush.msrb.mxu0 %v1129_v4  ;;  %1169 = vmatpush.msrb.mxu1 %v1130_v5  ;;  %v1207_v58 = vld [vmem:[#allocation11 + $0xa0] sm:$0xff]  ;;  %v1642_v4 = vld [vmem:[%s2345_s6] ss:$0 sm:$0xff] }
 0x489   : > { %1512 = vst.msk [vmem:[%s2230_s28 + $0x10] sm:$0xff] %vm722_vm1, %v903_v59  ;;  %1513 = vmatmul.msk.f32.vlgmr.msra.gmra.mxu0 %vm722_vm1, %v903_v59  ;;  %vm1025_vm1 = vcmask 523264   ;;  %v1116_v59 = vld [vmem:[#allocation10 + $0x48] sm:$0xff] }
 0x48a   : > { %1150 = vmatpush.msrb.mxu0 %v1127_v6  ;;  %1170 = vmatpush.msrb.mxu1 %v1128_v7  ;;  %v1189_v7 = vld [vmem:[#allocation11 + $0x10] sm:$0xff] }
 0x48c   : > { %1151 = vmatpush.msrb.mxu0 %v1125_v8  ;;  %1171 = vmatpush.msrb.mxu1 %v1126_v9  ;;  %v1205_v8 = vld [vmem:[#allocation11 + $0x90] sm:$0xff]  ;;  %v1188_v9 = vld [vmem:[#allocation11 + $0x8] sm:$0xff] }
 0x48e   : > { %1152 = vmatpush.msrb.mxu0 %v1123_v10  ;;  %1172 = vmatpush.msrb.mxu1 %v1124_v11  ;;  %v1204_v10 = vld [vmem:[#allocation11 + $0x88] sm:$0xff]  ;;  %v1187_v11 = vld [vmem:[#allocation11] sm:$0xff] }
 0x490   : > { %1153 = vmatpush.msrb.mxu0 %v1121_v12  ;;  %1173 = vmatpush.msrb.mxu1 %v1122_v13  ;;  %v1203_v12 = vld [vmem:[#allocation11 + $0x80] sm:$0xff] }
 0x492   : > { %1154 = vmatpush.msrb.mxu0 %v1119_v14  ;;  %1174 = vmatpush.msrb.mxu1 %v1120_v15 }
 0x494   : > { %1155 = vmatpush.msrb.mxu0 %v1117_v16  ;;  %1175 = vmatpush.msrb.mxu1 %v1118_v17 }
 0x496   : > { %1156 = vmatpush.msrb.mxu0 %v1115_v18  ;;  %1176 = vmatpush.msrb.mxu1 %v1116_v59 }
 0x498   : > { %1157 = vmatpush.msrb.mxu0 %v1113_v19  ;;  %1177 = vmatpush.msrb.mxu1 %v1114_v20  ;;  %v1643_v20 = vld [vmem:[%s2349_s10] ss:$0 sm:$0xff] }
 0x49a   : > { %1158 = vmatpush.msrb.mxu0 %v1111_v21  ;;  %1178 = vmatpush.msrb.mxu1 %v1112_v22 }
 0x49c   : > { %1159 = vmatpush.msrb.mxu0 %v1109_v23  ;;  %1179 = vmatpush.msrb.mxu1 %v1110_v24 }
 0x49e   : > { %1160 = vmatpush.msrb.mxu0 %v1107_v25  ;;  %1180 = vmatpush.msrb.mxu1 %v1108_v26 }
 0x506   : > { %v929_v31 = vpop.f32.mrf.mxu0 }
 0x507   : > { %1017 = vrot.lane.b32.xlu0 %v929_v31, %s1972_s21  ;;  %v1200_v31 = vld [vmem:[#allocation11 + $0x68] sm:$0xff] }
 0x508   : > { %1225 = vmatpush.msrb.mxu2 %v1200_v31 }
 0x50a   : > { %1226 = vmatpush.msrb.mxu2 %v1199_v35 }
 0x50f   : > { %1021 = vrot.lane.b32.xlu0 %v1009_v32, %s1971_s7  ;;  %v1216_v32 = vld [vmem:[#allocation11 + $0xe8] sm:$0xff] }
 0x510   : > { %1245 = vmatpush.msrb.mxu3 %v1216_v32 }
 0x512   : > { %1246 = vmatpush.msrb.mxu3 %v1215_v36 }
 0x514   : > { %1247 = vmatpush.msrb.mxu3 %v1214_v39 }
 0x579   : > { %v1018_v38 = vpop.permute.xlu0 %1017 }
 0x57a   : > { %v1026_v41 = vsel %vm1025_vm1, %v1024_v40, %v1018_v38  ;;  %v1198_v38 = vld [vmem:[#allocation11 + $0x58] sm:$0xff]  ;;  %v1197_v40 = vld [vmem:[#allocation11 + $0x50] sm:$0xff] }
 0x57b   : > { %1227 = vmatpush.msrb.mxu2 %v1198_v38 }
 0x57d   : > { %1228 = vmatpush.msrb.mxu2 %v1197_v40 }
 0x581   : > { %v1022_v42 = vpop.permute.xlu0 %1021 }
 0x582   : > { %v1028_v43 = vsel %vm1027_vm4, %v1026_v41, %v1022_v42  ;;  %v1213_v41 = vld [vmem:[#allocation11 + $0xd0] sm:$0xff]  ;;  %v1196_v42 = vld [vmem:[#allocation11 + $0x48] sm:$0xff] }
 0x583   : > { %1065 = vmatmul.f32.vlgmr.msra.gmra.mxu3 %v1028_v43  ;;  %v1212_v43 = vld [vmem:[#allocation11 + $0xc8] sm:$0xff]  ;;  %1229 = vmatpush.msrb.mxu2 %v1196_v42 }
 0x584   : > { %1248 = vmatpush.msrb.mxu3 %v1213_v41 }
 0x586   : > { %1249 = vmatpush.msrb.mxu3 %v1212_v43 }
 0x606   : > { %v1066_v45 = vpop.f32.mrf.mxu3 }
 0x607   : > { %v1067_v46 = vadd.f32 %v1640_v44, %v1066_v45  ;;  %v1195_v44 = vld [vmem:[#allocation11 + $0x40] sm:$0xff] }
 0x608   : > { %v1211_v45 = vld [vmem:[#allocation11 + $0xc0] sm:$0xff]  ;;  %1230 = vmatpush.msrb.mxu2 %v1195_v44 }
 0x609   : > { %v1069_v47 = vadd.f32 %v1067_v46, %v2194_v48  ;;  %1250 = vmatpush.msrb.mxu3 %v1211_v45 }
 0x60b   : > { %1072 = vadd.xlane.f32.xlu2 %v1069_v47  ;;  %1251 = vmatpush.msrb.mxu3 %v1210_v49 }
 0x60d   : > { %1252 = vmatpush.msrb.mxu3 %v1209_v52 }
 0x60f   : > { %1253 = vmatpush.msrb.mxu3 %v1208_v55 }
 0x611   : > { %1254 = vmatpush.msrb.mxu3 %v1207_v58 }
 0x67e   : > { %v1073_v48 = vpop.xlane.xlu2 %1072 }
 0x67f   : > { %v1081_v61 = vmul.f32 %v2259_v60, %v1073_v48 }
 0x681   : > { %v2262_v62 = vsub.f32 %v1069_v47, %v1081_v61  ;;  %v1194_v47 = vld [vmem:[#allocation11 + $0x38] sm:$0xff] }
 0x682   : > { %1231 = vmatpush.msrb.mxu2 %v1194_v47  ;;  %v1190_v61 = vld [vmem:[#allocation11 + $0x18] sm:$0xff] }
 0x683   : > { %v1083_v63 = vmul.f32 %v2262_v62, %v2262_v62 }
 0x684   : > { %1232 = vmatpush.msrb.mxu2 %v1193_v51 }
 0x685   : > { %1084 = vadd.xlane.f32.xlu1 %v1083_v63  ;;  %v1206_v63 = vld [vmem:[#allocation11 + $0x98] sm:$0xff] }
 0x686   : > { %1233 = vmatpush.msrb.mxu2 %v1192_v54  ;;  %1255 = vmatpush.msrb.mxu3 %v1206_v63 }
 0x688   : > { %1234 = vmatpush.msrb.mxu2 %v1191_v57  ;;  %1256 = vmatpush.msrb.mxu3 %v1205_v8 }
 0x68a   : > { %1235 = vmatpush.msrb.mxu2 %v1190_v61  ;;  %1257 = vmatpush.msrb.mxu3 %v1204_v10 }
 0x68c   : > { %1236 = vmatpush.msrb.mxu2 %v1189_v7  ;;  %1258 = vmatpush.msrb.mxu3 %v1203_v12 }
 0x68e   : > { %1237 = vmatpush.msrb.mxu2 %v1188_v9 }
 0x690   : > { %1238 = vmatpush.msrb.mxu2 %v1187_v11 }
 0x6f8   : > { %v1085_v33 = vpop.xlane.xlu1 %1084 }
 0x6f9   : > { %v1086_v34 = vmul.f32 %v1085_v33, %v2259_v60 }
 0x6fb   : > { %v1087_v37 = vadd.f32 1e-05, %v1086_v34 }
 0x6fd   : > { %1664 = vrsqrt.f32 %v1087_v37  ;;  %vm1094_vm6 = vweird.f32 %v1087_v37 }
 0x703   : > { %v1665_v46 = vpop.eup %1664 }
 0x704   : > { %v1089_v50 = vmul.f32 %v1665_v46, %v1087_v37  ;;  %vm1095_vm5 = vweird.f32 %v1665_v46 }
 0x705   : > { %vm1096_vm7 = vmor %vm1094_vm6, %vm1095_vm5 }
 0x706   : > { %v1090_v53 = vmul.f32 %v1665_v46, %v1089_v50 }
 0x708   : > { %v1091_v56 = vmul.f32 0.5, %v1090_v53 }
 0x70a   : > { %v1092_v48 = vsub.f32 1.5, %v1091_v56 }
 0x70c   : > { %v1093_v0 = vmul.f32 %v1665_v46, %v1092_v48 }
 0x70e   : > { %v1097_v2 = vsel %vm1096_vm7, %v1665_v46, %v1093_v0 }
 0x70f   : > { %v1098_v3 = vmul.f32 %v1097_v2, %v2262_v62  ;;  %v1139_v62 = vld [vmem:[%s2347_s8] sm:$0x3] }
 0x710   : > { %v1141_v13 = vperm.slane %v1139_v62, 0  ;;  %v1142_v14 = vperm.slane %v1139_v62, 1 }
 0x711   : > { %v1102_v5 = vmul.f32 %v1641_v1, %v1098_v3 }
 0x713   : > { %v1106_v6 = vadd.f32 %v1642_v4, %v1102_v5 }
 0x715   : > { %1161 = vmatmul.f32.vlgmr.msrb.gmra.mxu0 %v1106_v6  ;;  %1181 = vmatmul.f32.vlgmr.msrb.gmra.mxu1 %v1106_v6 }
 0x792   : > { %v1162_v15 = vpop.f32.mrf.mxu0  ;;  %v1182_v16 = vpop.f32.mrf.mxu1 }
 0x793   : > { %v1163_v17 = vadd.f32 %v1162_v15, %v1141_v13  ;;  %v1183_v18 = vadd.f32 %v1182_v16, %v1142_v14 }
 0x795   : > { %v1185_v59 = vmax.f32 %v1163_v17, 0.0  ;;  %v1186_v19 = vmax.f32 %v1183_v18, 0.0 }
 0x797   : > { %1239 = vmatmul.f32.vlgmr.msrb.gmra.mxu2 %v1185_v59  ;;  %1259 = vmatmul.f32.vlgmr.msrb.gmra.mxu3 %v1186_v19 }
 0x81a   : > { %v1240_v21 = vpop.f32.mrf.mxu2  ;;  %v1260_v23 = vpop.f32.mrf.mxu3 }
 0x81b   : > { %v1241_v22 = vadd.f32 %v1643_v20, %v1240_v21 }
 0x81d   : > { %v1261_v24 = vadd.f32 %v1260_v23, %v1241_v22 }
 0x81f   : > { %v1263_v25 = vadd.f32 %v1261_v24, %v1106_v6 }
 0x821   : > { %1266 = vadd.xlane.f32.xlu0 %v1263_v25 }
 0x894   : > { %v1267_v26 = vpop.xlane.xlu0 %1266 }
 0x895   : > { %v1268_v27 = vmul.f32 %v1267_v26, %v2259_v60 }
 0x897   : > { %v1269_v28 = vsub.f32 %v1263_v25, %v1268_v27 }
 0x899   : > { %v1270_v29 = vmul.f32 %v1269_v28, %v1269_v28 }
 0x89b   : > { %1271 = vadd.xlane.f32.xlu2 %v1270_v29 }
 0x89c   : > { %1875 = shalt.err (!%p1872_p9)
}
 0x89d   : > { %s1975_s28 = smov 128   ;;  %s1976_s27 = smov 8  }
 0x89e   : > { %1549 = dma.vmem_to_hbm [thread:$0]  (%p2138_p13), %s1328_s13, 512, %s1330_s17, %s1301_s11, %s1975_s28, %s1975_s28, %s1976_s27  }
 0x89f   : > { %s1520_s0 = sshll.u32 %s2076_s20, 3  ;;  %s2380_s12 = sld [smem:[#allocation28_spill]] }
 0x8a0   : > { %s2381_s13 = sld [smem:[#allocation30_spill]]  ;;  %s2383_s20 = sshll.u32 %s2169_s24, 3 }
 0x8a1   : > { %s2382_s2 = sld [smem:[#allocation29_spill]]  ;;  %s569_s7 = scalar_lea.vmem [#allocation13], %s2383_s20 }
 0x8a2   : > { %s1313_s21 = sshll.u32 %s569_s7, 4  ;;  %s1296_s27 = scalar_lea.sflag [#allocation4], %s2169_s24  ;;  %s1314_s21 = int_to_ptr.vmem [resolvable:$true] %s1313_s21 }
 0x8a5   : > { %v1644_v39 = vld [vmem:[%s2380_s12] ss:$0 sm:$0xff] }
 0x8a6   : > { %s1311_s17 = scalar_lea.hbm %s2381_s13, %s1520_s0  ;;  %s1896_s22 = scalar_lea.hbm %s2381_s13, 16 }
 0x8a7   : > { %v1645_v41 = vld [vmem:[%s2382_s2] ss:$0 sm:$0xff]  ;;  %s1315_s28 = sshll.u32 %s1311_s17, 4  ;;  %s1316_s28 = int_to_ptr.hbm [resolvable:$true] %s1315_s28 }
 0x8a8   : > { %s1890_s4 = sshra.s32 %s1316_s28, 4  ;;  %s1891_s4 = int_to_ptr.hbm [resolvable:$true] %s1890_s4 }
 0x8a9   : > { %s1892_s0 = scalar_lea.hbm %s1891_s4, 8  ;;  %p1897_p2 = scmp.lt.s32.totalorder %s1891_s4, %s2381_s13 }
 0x8aa   : > { %p1893_p10 = scmp.ne.s32.totalorder %s1891_s4, %s1892_s0  ;;  %p1898_p6 = scmp.lt.s32.totalorder %s1896_s22, %s1892_s0 }
 0x8ac   : > { %p1894_p11 = pnand %p1893_p10, %p2138_p13  ;;  %p1899_p1 = por %p1898_p6, %p1897_p2 }
 0x8ae   : > { %p1895_p0 = pneg %p1894_p11 }
 0x8b0   : > { %p1900_p3 = pnand %p1899_p1, %p1895_p0 }
 0x90e   : > { %v1272_v30 = vpop.xlane.xlu2 %1271 }
 0x90f   : > { %v1273_v31 = vmul.f32 %v1272_v30, %v2259_v60 }
 0x911   : > { %v1274_v32 = vadd.f32 1e-05, %v1273_v31 }
 0x913   : > { %1666 = vrsqrt.f32 %v1274_v32  ;;  %vm1281_vm9 = vweird.f32 %v1274_v32 }
 0x919   : > { %v1667_v33 = vpop.eup %1666 }
 0x91a   : > { %v1276_v34 = vmul.f32 %v1667_v33, %v1274_v32  ;;  %vm1282_vm8 = vweird.f32 %v1667_v33 }
 0x91b   : > { %vm1283_vm10 = vmor %vm1281_vm9, %vm1282_vm8 }
 0x91c   : > { %v1277_v35 = vmul.f32 %v1667_v33, %v1276_v34 }
 0x91e   : > { %v1278_v36 = vmul.f32 0.5, %v1277_v35 }
 0x920   : > { %v1279_v37 = vsub.f32 1.5, %v1278_v36 }
 0x922   : > { %v1280_v38 = vmul.f32 %v1667_v33, %v1279_v37 }
 0x924   : > { %v1284_v60 = vsel %vm1283_vm10, %v1667_v33, %v1280_v38 }
 0x925   : > { %v1285_v40 = vmul.f32 %v1284_v60, %v1269_v28 }
 0x927   : > { %v1289_v42 = vmul.f32 %v1644_v39, %v1285_v40 }
 0x929   : > { %v1293_v43 = vadd.f32 %v1645_v41, %v1289_v42 }
 0x92b   : > { %1294 = vst [vmem:[%s569_s7] sm:$0xff] %v1293_v43 }
 0x92c   : > { %1903 = shalt.err (!%p1900_p3)
}
 0x92d   : > { %1548 = dma.vmem_to_hbm [thread:$0]  (%p2138_p13), %s1314_s21, 128, %s1316_s28, %s1296_s27  }
 0x92e PF: > { %s1344_s24 = sand.u32 1, %s1946_s29   ;;  %p2384_p5 = scmp.ge.s32.totalorder %s1958_s16, 2 }
 0x92f   : > { %s1345_s17 = scalar_lea.sflag [#allocation4], %s1344_s24 }
 0x930   : > { %p1573_p12 = pnand %p2384_p5, %p2143_p4 }
 0x932   : > { %p1574_p8 = pneg %p1573_p12 }
 0x934   : > { %1937 = dma.done.wait (%p1574_p8), %s1345_s17, 128  }
 0x935   : > { %1939 = vsyncadd (%p1574_p8), %s1345_s17, 4294967168  ;;  %s1355_s26 = scalar_lea.sflag [#allocation15], %s1344_s24 }
 0x936   : > { %1941 = dma.done.wait (%p1574_p8), %s1355_s26, 512  }
 0x937   : > { %1943 = vsyncadd (%p1574_p8), %s1355_s26, 4294966784  ;;  %p34_p13 = scmp.ge.s32.totalorder %s2118_s25, 4   ;;  %s2385_s29 = smov %s1950_s30 }
 0x938   : > { %s2386_s30 = smov %s1954_s15  ;;  %s2387_s15 = smov %s2130_s23 }
 0x939   : > { %s2388_s16 = smov %s2118_s25  ;;  %36 = sbr.rel (!%p34_p13) target bundleno = 21 (0x15), region = 157 }
 0x93e   :  { %1361 = vsyncpa [#allocation3], 1 }
 0x93f   :  { %1363 = vsyncpa [#allocation3 + $0x1], 1 }
 0x940   :  { %1364 = vsyncpa [#allocation6], 1 }
 0x941   :  { %1365 = vsyncpa [#allocation9], 1 }
 0x942   :  { %1366 = vsyncpa [#allocation12], 1 }
 0x943   :  { %1367 = vsyncpa [#allocation4], 1 }
 0x944   :  { %1369 = vsyncpa [#allocation4 + $0x1], 1 }
 0x945   :  { %1370 = vsyncpa [#allocation15], 1 }
 0x946   :  { %1372 = vsyncpa [#allocation15 + $0x1], 1 }

</bundles_post_ra>
